<compile_context>
chip_gen: v7x
topology: tpu7x:2x2x1
jax: 0.10.0
libtpu: 0.0.40
codegen_flags: <defaults>
</compile_context>

<pallas_src>
import jax
import jax.numpy as jnp
from jax.experimental import pallas as pl
from jax.experimental.pallas import tpu as pltpu


def _round_up(a, m):
    return ((a + m - 1) // m) * m


# ---------------------------------------------------------------------------
# Kernel: full CNNEncoder forward for one batch tile (batch on lanes).
# Ref layout: x_ref, [w_1, b_1, ..., w_n, b_n, wh, bh], o_ref
#   x_ref : [L, F, tile_b]
#   w_i   : [2, C_out, C_in]   (tap-stacked conv weight)
#   b_i   : [C_out, 1]
#   wh    : [L_out, n_out, C]  (head weight split per output time step)
#   bh    : [n_out, 1]
#   o_ref : [n_out, tile_b]
# ---------------------------------------------------------------------------
def _cnn_encoder_kernel(x_ref, *refs):
    o_ref = refs[-1]
    bh_ref = refs[-2]
    wh_ref = refs[-3]
    conv_refs = refs[:-3]
    n_layers = len(conv_refs) // 2

    x = x_ref[...].astype(jnp.float32)                       # [L, F, tb]
    # Per-time-step activations, each [C, tile_b]: leading-axis indexing only,
    # so there are no slice/reshape relayout copies anywhere in the kernel.
    hs = [x[t] for t in range(x.shape[0])]

    for layer in range(n_layers):
        w = conv_refs[2 * layer][...].astype(jnp.float32)     # [2, C_out, C_in]
        b = conv_refs[2 * layer + 1][...].astype(jnp.float32)  # [C_out, 1]
        w0, w1 = w[0], w[1]
        new_hs = []
        for t in range(len(hs) - 1):
            # kernel_size=2 "valid" conv == W0 @ h[t] + W1 @ h[t+1]
            y = (jnp.dot(w0, hs[t], preferred_element_type=jnp.float32)
                 + jnp.dot(w1, hs[t + 1], preferred_element_type=jnp.float32)
                 + b)
            new_hs.append(jnp.maximum(y, 0.0))                # ReLU
        hs = new_hs

    wh = wh_ref[...].astype(jnp.float32)                      # [L_out, n_out, C]
    out = bh_ref[...].astype(jnp.float32)                     # [n_out, 1] broadcasts
    out = out + jnp.dot(wh[0], hs[0], preferred_element_type=jnp.float32)
    for l in range(1, len(hs)):
        out = out + jnp.dot(wh[l], hs[l], preferred_element_type=jnp.float32)
    o_ref[...] = out.astype(o_ref.dtype)                      # [n_out, tb] lane-dense


# ---------------------------------------------------------------------------
# One-time host-side parameter preparation from PyTorch-layout params.
#   conv weight [C_out, C_in, 2] -> tap-stacked [2, C_out, C_in]; bias -> [C_out, 1]
#   head weight [N_out, C*L_out] (torch .view is channel-major: j = c*L_out + l)
#             -> [L_out, N_out, C] so the head is a sum of per-time-step matmuls.
# ---------------------------------------------------------------------------
def prepare_params(conv_params, head_params, dtype=jnp.float32):
    conv_ws, conv_bs = [], []
    for (w, b) in conv_params:
        conv_ws.append(jnp.transpose(w, (2, 0, 1)).astype(dtype))   # [2, C_out, C_in]
        conv_bs.append(b.reshape(-1, 1).astype(dtype))               # [C_out, 1]
    wh_pt, bh = head_params
    n_out = wh_pt.shape[0]
    c = conv_params[-1][0].shape[0]                                  # last conv C_out
    l_out = wh_pt.shape[1] // c
    wh = wh_pt.reshape(n_out, c, l_out).transpose(2, 0, 1).astype(dtype)  # [L_out, n_out, C]
    return conv_ws, conv_bs, wh, bh.reshape(-1, 1).astype(dtype)


# ---------------------------------------------------------------------------
# Wrapper: single fused pallas_call, batch-tiled grid, resident weights,
# batch-on-lanes activation/output layout.
# ---------------------------------------------------------------------------
def cnn_encoder_forward(x, prepared_params, *, tile_b=None):
    conv_ws, conv_bs, wh, bh = prepared_params
    B, L, F = x.shape
    n_layers = len(conv_ws)
    l_out = L - n_layers
    n_out = wh.shape[1]
    assert wh.shape[0] == l_out

    if tile_b is None:
        # Large tiles amortize the ~0.35 us/grid-step overhead; multiple of 128
        # keeps lane-aligned, lane-dense blocks.
        tile_b = min(512, _round_up(B, 128))
    Bp = _round_up(B, tile_b)

    # Host-side relayout: [B, L, F] -> [L, F, Bp] (channels on sublanes, batch
    # on lanes). Zero-pad batch so all blocks are full (no NaNs in padded lanes).
    xt = jnp.transpose(x, (1, 2, 0))
    if Bp != B:
        xt = jnp.pad(xt, ((0, 0), (0, 0), (0, Bp - B)))

    inputs = [xt]
    in_specs = [pl.BlockSpec((L, F, tile_b), lambda i: (0, 0, i))]
    for w, b in zip(conv_ws, conv_bs):
        inputs += [w, b]
        in_specs += [pl.BlockSpec(w.shape, lambda i: (0, 0, 0)),   # resident
                     pl.BlockSpec(b.shape, lambda i: (0, 0))]
    inputs += [wh, bh]
    in_specs += [pl.BlockSpec(wh.shape, lambda i: (0, 0, 0)),
                 pl.BlockSpec(bh.shape, lambda i: (0, 0))]

    # Advisory cost estimate so XLA can overlap this small custom call.
    flops = 0
    c_in, lc = F, L
    for w in conv_ws:
        c_out = w.shape[1]
        flops += 2 * Bp * (lc - 1) * c_out * (2 * c_in)
        c_in, lc = c_out, lc - 1
    flops += 2 * Bp * n_out * (lc * c_in)
    bytes_accessed = 4 * (xt.size + Bp * n_out
                          + sum(w.size for w in conv_ws)
                          + sum(b.size for b in conv_bs)
                          + wh.size + bh.size)

    out_t = pl.pallas_call(
        _cnn_encoder_kernel,
        out_shape=jax.ShapeDtypeStruct((n_out, Bp), x.dtype),
        grid=(Bp // tile_b,),
        in_specs=in_specs,
        out_specs=pl.BlockSpec((n_out, tile_b), lambda i: (0, i)),
        compiler_params=pltpu.CompilerParams(
            dimension_semantics=("parallel",)),   # batch tiles are independent
        cost_estimate=pl.CostEstimate(
            flops=flops, transcendentals=0, bytes_accessed=bytes_accessed),
    )(*inputs)

    return jnp.transpose(out_t[:, :B])            # [B, n_out]


# ---------------------------------------------------------------------------
# Pure-JAX reference (mirrors the PyTorch forward exactly) for validation.
# ---------------------------------------------------------------------------
def cnn_encoder_ref(x, conv_params, head_params):
    h = jnp.transpose(x, (0, 2, 1))                           # [B, F, L]
    for (w, b) in conv_params:
        h = jax.lax.conv_general_dilated(
            h, w, window_strides=(1,), padding="VALID",
            dimension_numbers=("NCH", "OIH", "NCH"))
        h = h + b[None, :, None]
        h = jnp.maximum(h, 0.0)
    flat = h.reshape(h.shape[0], -1)                          # channel-major (= torch .view)
    wh, bh = head_params
    return flat @ wh.T + bh


if __name__ == "__main__":
    # Small shapes consistent with the module.
    batch = 2
    n_features = 4
    n_previous_timesteps = 8          # -> input length L = 9
    n_neurons = 32
    n_cnn_layers = 2

    L = n_previous_timesteps + 1
    l_out = L - n_cnn_layers          # 7
    head_in = l_out * n_neurons       # 224

    key = jax.random.PRNGKey(0)
    keys = jax.random.split(key, 2 * n_cnn_layers + 4)

    # PyTorch-layout parameters (Conv1d weight [out, in, k], Linear weight [out, in]).
    conv_params = []
    c_in = n_features
    for i in range(n_cnn_layers):
        w = 0.1 * jax.random.normal(keys[2 * i], (n_neurons, c_in, 2), dtype=jnp.float32)
        b = 0.1 * jax.random.normal(keys[2 * i + 1], (n_neurons,), dtype=jnp.float32)
        conv_params.append((w, b))
        c_in = n_neurons
    wh_pt = 0.1 * jax.random.normal(keys[-4], (n_neurons, head_in), dtype=jnp.float32)
    bh_pt = 0.1 * jax.random.normal(keys[-3], (n_neurons,), dtype=jnp.float32)

    prepared = prepare_params(conv_params, (wh_pt, bh_pt))

    # Primary small example (B=2): single full block, padded batch lanes are zeros.
    x = jax.random.normal(keys[-2], (batch, L, n_features), dtype=jnp.float32)
    out = jax.block_until_ready(cnn_encoder_forward(x, prepared))
    ref = cnn_encoder_ref(x, conv_params, (wh_pt, bh_pt))
    assert out.shape == (batch, n_neurons)
    assert jnp.allclose(out, ref, rtol=1e-3, atol=1e-3), "mismatch vs reference (B=2)"

    # Secondary check exercising multi-tile grid + batch padding (B=600 -> 2 tiles).
    x_big = jax.random.normal(keys[-1], (600, L, n_features), dtype=jnp.float32)
    out_big = jax.block_until_ready(cnn_encoder_forward(x_big, prepared))
    ref_big = cnn_encoder_ref(x_big, conv_params, (wh_pt, bh_pt))
    assert out_big.shape == (600, n_neurons)
    assert jnp.allclose(out_big, ref_big, rtol=1e-3, atol=1e-3), "mismatch vs reference (B=600)"

    print("KERNEL_OK")
</pallas_src>

<mosaic_0001>
module attributes {stable_mosaic.version = 11 : i64} {
  func.func @_cnn_encoder_kernel(%arg0: i32, %arg1: memref<9x4x128xf32, #tpu.memory_space<vmem>>, %arg2: memref<2x32x4xf32, #tpu.memory_space<vmem>>, %arg3: memref<32x1xf32, #tpu.memory_space<vmem>>, %arg4: memref<2x32x32xf32, #tpu.memory_space<vmem>>, %arg5: memref<32x1xf32, #tpu.memory_space<vmem>>, %arg6: memref<7x32x32xf32, #tpu.memory_space<vmem>>, %arg7: memref<32x1xf32, #tpu.memory_space<vmem>>, %arg8: memref<32x128xf32, #tpu.memory_space<vmem>>) attributes {dimension_semantics = [#tpu.dimension_semantics<parallel>], iteration_bounds = array<i64: 1>, scalar_prefetch = 0 : i64, scratch_operands = 0 : i64, tpu.core_type = #tpu.core_type<tc>, window_params = [{transform_indices = @transform_0, window_bounds = array<i64: 9, 4, 128>}, {pipeline_mode = #tpu.pipeline_mode<synchronous>, transform_indices = @transform_1, window_bounds = array<i64: 2, 32, 4>}, {pipeline_mode = #tpu.pipeline_mode<synchronous>, transform_indices = @transform_2, window_bounds = array<i64: 32, 1>}, {pipeline_mode = #tpu.pipeline_mode<synchronous>, transform_indices = @transform_3, window_bounds = array<i64: 2, 32, 32>}, {pipeline_mode = #tpu.pipeline_mode<synchronous>, transform_indices = @transform_4, window_bounds = array<i64: 32, 1>}, {pipeline_mode = #tpu.pipeline_mode<synchronous>, transform_indices = @transform_5, window_bounds = array<i64: 7, 32, 32>}, {pipeline_mode = #tpu.pipeline_mode<synchronous>, transform_indices = @transform_6, window_bounds = array<i64: 32, 1>}, {transform_indices = @transform_7, window_bounds = array<i64: 32, 128>}]} {
    %c0 = arith.constant 0 : index
    %c0_0 = arith.constant 0 : index
    %c0_1 = arith.constant 0 : index
    %0 = vector.load %arg1[%c0, %c0_0, %c0_1] : memref<9x4x128xf32, #tpu.memory_space<vmem>>, vector<9x4x128xf32>
    %1 = vector.extract_strided_slice %0 {offsets = [0, 0, 0], sizes = [1, 4, 128], strides = [1, 1, 1]} : vector<9x4x128xf32> to vector<1x4x128xf32>
    %2 = vector.shape_cast %1 : vector<1x4x128xf32> to vector<4x128xf32>
    %3 = vector.extract_strided_slice %0 {offsets = [1, 0, 0], sizes = [1, 4, 128], strides = [1, 1, 1]} : vector<9x4x128xf32> to vector<1x4x128xf32>
    %4 = vector.shape_cast %3 : vector<1x4x128xf32> to vector<4x128xf32>
    %5 = vector.extract_strided_slice %0 {offsets = [2, 0, 0], sizes = [1, 4, 128], strides = [1, 1, 1]} : vector<9x4x128xf32> to vector<1x4x128xf32>
    %6 = vector.shape_cast %5 : vector<1x4x128xf32> to vector<4x128xf32>
    %7 = vector.extract_strided_slice %0 {offsets = [3, 0, 0], sizes = [1, 4, 128], strides = [1, 1, 1]} : vector<9x4x128xf32> to vector<1x4x128xf32>
    %8 = vector.shape_cast %7 : vector<1x4x128xf32> to vector<4x128xf32>
    %9 = vector.extract_strided_slice %0 {offsets = [4, 0, 0], sizes = [1, 4, 128], strides = [1, 1, 1]} : vector<9x4x128xf32> to vector<1x4x128xf32>
    %10 = vector.shape_cast %9 : vector<1x4x128xf32> to vector<4x128xf32>
    %11 = vector.extract_strided_slice %0 {offsets = [5, 0, 0], sizes = [1, 4, 128], strides = [1, 1, 1]} : vector<9x4x128xf32> to vector<1x4x128xf32>
    %12 = vector.shape_cast %11 : vector<1x4x128xf32> to vector<4x128xf32>
    %13 = vector.extract_strided_slice %0 {offsets = [6, 0, 0], sizes = [1, 4, 128], strides = [1, 1, 1]} : vector<9x4x128xf32> to vector<1x4x128xf32>
    %14 = vector.shape_cast %13 : vector<1x4x128xf32> to vector<4x128xf32>
    %15 = vector.extract_strided_slice %0 {offsets = [7, 0, 0], sizes = [1, 4, 128], strides = [1, 1, 1]} : vector<9x4x128xf32> to vector<1x4x128xf32>
    %16 = vector.shape_cast %15 : vector<1x4x128xf32> to vector<4x128xf32>
    %17 = vector.extract_strided_slice %0 {offsets = [8, 0, 0], sizes = [1, 4, 128], strides = [1, 1, 1]} : vector<9x4x128xf32> to vector<1x4x128xf32>
    %18 = vector.shape_cast %17 : vector<1x4x128xf32> to vector<4x128xf32>
    %c0_2 = arith.constant 0 : index
    %c0_3 = arith.constant 0 : index
    %c0_4 = arith.constant 0 : index
    %19 = vector.load %arg2[%c0_2, %c0_3, %c0_4] : memref<2x32x4xf32, #tpu.memory_space<vmem>>, vector<2x32x4xf32>
    %c0_5 = arith.constant 0 : index
    %c0_6 = arith.constant 0 : index
    %20 = vector.load %arg3[%c0_5, %c0_6] : memref<32x1xf32, #tpu.memory_space<vmem>>, vector<32x1xf32>
    %21 = vector.extract_strided_slice %19 {offsets = [0, 0, 0], sizes = [1, 32, 4], strides = [1, 1, 1]} : vector<2x32x4xf32> to vector<1x32x4xf32>
    %22 = vector.shape_cast %21 : vector<1x32x4xf32> to vector<32x4xf32>
    %23 = vector.extract_strided_slice %19 {offsets = [1, 0, 0], sizes = [1, 32, 4], strides = [1, 1, 1]} : vector<2x32x4xf32> to vector<1x32x4xf32>
    %24 = vector.shape_cast %23 : vector<1x32x4xf32> to vector<32x4xf32>
    %cst = arith.constant dense<0.000000e+00> : vector<32x128xf32>
    %25 = tpu.matmul %22, %2, %cst {dimension_numbers = #tpu.dot_dimension_numbers<[1], [0], [0], [1], [0, 0, 1, 1], [], []>} : vector<32x4xf32>, vector<4x128xf32>, vector<32x128xf32> -> vector<32x128xf32>
    %cst_7 = arith.constant dense<0.000000e+00> : vector<32x128xf32>
    %26 = tpu.matmul %24, %4, %cst_7 {dimension_numbers = #tpu.dot_dimension_numbers<[1], [0], [0], [1], [0, 0, 1, 1], [], []>} : vector<32x4xf32>, vector<4x128xf32>, vector<32x128xf32> -> vector<32x128xf32>
    %27 = arith.addf %25, %26 : vector<32x128xf32>
    %28 = vector.broadcast %20 : vector<32x1xf32> to vector<32x128xf32>
    %29 = arith.addf %27, %28 : vector<32x128xf32>
    %cst_8 = arith.constant 0.000000e+00 : f32
    %30 = vector.broadcast %cst_8 : f32 to vector<32x128xf32>
    %31 = arith.maximumf %29, %30 : vector<32x128xf32>
    %cst_9 = arith.constant dense<0.000000e+00> : vector<32x128xf32>
    %32 = tpu.matmul %22, %4, %cst_9 {dimension_numbers = #tpu.dot_dimension_numbers<[1], [0], [0], [1], [0, 0, 1, 1], [], []>} : vector<32x4xf32>, vector<4x128xf32>, vector<32x128xf32> -> vector<32x128xf32>
    %cst_10 = arith.constant dense<0.000000e+00> : vector<32x128xf32>
    %33 = tpu.matmul %24, %6, %cst_10 {dimension_numbers = #tpu.dot_dimension_numbers<[1], [0], [0], [1], [0, 0, 1, 1], [], []>} : vector<32x4xf32>, vector<4x128xf32>, vector<32x128xf32> -> vector<32x128xf32>
    %34 = arith.addf %32, %33 : vector<32x128xf32>
    %35 = vector.broadcast %20 : vector<32x1xf32> to vector<32x128xf32>
    %36 = arith.addf %34, %35 : vector<32x128xf32>
    %cst_11 = arith.constant 0.000000e+00 : f32
    %37 = vector.broadcast %cst_11 : f32 to vector<32x128xf32>
    %38 = arith.maximumf %36, %37 : vector<32x128xf32>
    %cst_12 = arith.constant dense<0.000000e+00> : vector<32x128xf32>
    %39 = tpu.matmul %22, %6, %cst_12 {dimension_numbers = #tpu.dot_dimension_numbers<[1], [0], [0], [1], [0, 0, 1, 1], [], []>} : vector<32x4xf32>, vector<4x128xf32>, vector<32x128xf32> -> vector<32x128xf32>
    %cst_13 = arith.constant dense<0.000000e+00> : vector<32x128xf32>
    %40 = tpu.matmul %24, %8, %cst_13 {dimension_numbers = #tpu.dot_dimension_numbers<[1], [0], [0], [1], [0, 0, 1, 1], [], []>} : vector<32x4xf32>, vector<4x128xf32>, vector<32x128xf32> -> vector<32x128xf32>
    %41 = arith.addf %39, %40 : vector<32x128xf32>
    %42 = vector.broadcast %20 : vector<32x1xf32> to vector<32x128xf32>
    %43 = arith.addf %41, %42 : vector<32x128xf32>
    %cst_14 = arith.constant 0.000000e+00 : f32
    %44 = vector.broadcast %cst_14 : f32 to vector<32x128xf32>
    %45 = arith.maximumf %43, %44 : vector<32x128xf32>
    %cst_15 = arith.constant dense<0.000000e+00> : vector<32x128xf32>
    %46 = tpu.matmul %22, %8, %cst_15 {dimension_numbers = #tpu.dot_dimension_numbers<[1], [0], [0], [1], [0, 0, 1, 1], [], []>} : vector<32x4xf32>, vector<4x128xf32>, vector<32x128xf32> -> vector<32x128xf32>
    %cst_16 = arith.constant dense<0.000000e+00> : vector<32x128xf32>
    %47 = tpu.matmul %24, %10, %cst_16 {dimension_numbers = #tpu.dot_dimension_numbers<[1], [0], [0], [1], [0, 0, 1, 1], [], []>} : vector<32x4xf32>, vector<4x128xf32>, vector<32x128xf32> -> vector<32x128xf32>
    %48 = arith.addf %46, %47 : vector<32x128xf32>
    %49 = vector.broadcast %20 : vector<32x1xf32> to vector<32x128xf32>
    %50 = arith.addf %48, %49 : vector<32x128xf32>
    %cst_17 = arith.constant 0.000000e+00 : f32
    %51 = vector.broadcast %cst_17 : f32 to vector<32x128xf32>
    %52 = arith.maximumf %50, %51 : vector<32x128xf32>
    %cst_18 = arith.constant dense<0.000000e+00> : vector<32x128xf32>
    %53 = tpu.matmul %22, %10, %cst_18 {dimension_numbers = #tpu.dot_dimension_numbers<[1], [0], [0], [1], [0, 0, 1, 1], [], []>} : vector<32x4xf32>, vector<4x128xf32>, vector<32x128xf32> -> vector<32x128xf32>
    %cst_19 = arith.constant dense<0.000000e+00> : vector<32x128xf32>
    %54 = tpu.matmul %24, %12, %cst_19 {dimension_numbers = #tpu.dot_dimension_numbers<[1], [0], [0], [1], [0, 0, 1, 1], [], []>} : vector<32x4xf32>, vector<4x128xf32>, vector<32x128xf32> -> vector<32x128xf32>
    %55 = arith.addf %53, %54 : vector<32x128xf32>
    %56 = vector.broadcast %20 : vector<32x1xf32> to vector<32x128xf32>
    %57 = arith.addf %55, %56 : vector<32x128xf32>
    %cst_20 = arith.constant 0.000000e+00 : f32
    %58 = vector.broadcast %cst_20 : f32 to vector<32x128xf32>
    %59 = arith.maximumf %57, %58 : vector<32x128xf32>
    %cst_21 = arith.constant dense<0.000000e+00> : vector<32x128xf32>
    %60 = tpu.matmul %22, %12, %cst_21 {dimension_numbers = #tpu.dot_dimension_numbers<[1], [0], [0], [1], [0, 0, 1, 1], [], []>} : vector<32x4xf32>, vector<4x128xf32>, vector<32x128xf32> -> vector<32x128xf32>
    %cst_22 = arith.constant dense<0.000000e+00> : vector<32x128xf32>
    %61 = tpu.matmul %24, %14, %cst_22 {dimension_numbers = #tpu.dot_dimension_numbers<[1], [0], [0], [1], [0, 0, 1, 1], [], []>} : vector<32x4xf32>, vector<4x128xf32>, vector<32x128xf32> -> vector<32x128xf32>
    %62 = arith.addf %60, %61 : vector<32x128xf32>
    %63 = vector.broadcast %20 : vector<32x1xf32> to vector<32x128xf32>
    %64 = arith.addf %62, %63 : vector<32x128xf32>
    %cst_23 = arith.constant 0.000000e+00 : f32
    %65 = vector.broadcast %cst_23 : f32 to vector<32x128xf32>
    %66 = arith.maximumf %64, %65 : vector<32x128xf32>
    %cst_24 = arith.constant dense<0.000000e+00> : vector<32x128xf32>
    %67 = tpu.matmul %22, %14, %cst_24 {dimension_numbers = #tpu.dot_dimension_numbers<[1], [0], [0], [1], [0, 0, 1, 1], [], []>} : vector<32x4xf32>, vector<4x128xf32>, vector<32x128xf32> -> vector<32x128xf32>
    %cst_25 = arith.constant dense<0.000000e+00> : vector<32x128xf32>
    %68 = tpu.matmul %24, %16, %cst_25 {dimension_numbers = #tpu.dot_dimension_numbers<[1], [0], [0], [1], [0, 0, 1, 1], [], []>} : vector<32x4xf32>, vector<4x128xf32>, vector<32x128xf32> -> vector<32x128xf32>
    %69 = arith.addf %67, %68 : vector<32x128xf32>
    %70 = vector.broadcast %20 : vector<32x1xf32> to vector<32x128xf32>
    %71 = arith.addf %69, %70 : vector<32x128xf32>
    %cst_26 = arith.constant 0.000000e+00 : f32
    %72 = vector.broadcast %cst_26 : f32 to vector<32x128xf32>
    %73 = arith.maximumf %71, %72 : vector<32x128xf32>
    %cst_27 = arith.constant dense<0.000000e+00> : vector<32x128xf32>
    %74 = tpu.matmul %22, %16, %cst_27 {dimension_numbers = #tpu.dot_dimension_numbers<[1], [0], [0], [1], [0, 0, 1, 1], [], []>} : vector<32x4xf32>, vector<4x128xf32>, vector<32x128xf32> -> vector<32x128xf32>
    %cst_28 = arith.constant dense<0.000000e+00> : vector<32x128xf32>
    %75 = tpu.matmul %24, %18, %cst_28 {dimension_numbers = #tpu.dot_dimension_numbers<[1], [0], [0], [1], [0, 0, 1, 1], [], []>} : vector<32x4xf32>, vector<4x128xf32>, vector<32x128xf32> -> vector<32x128xf32>
    %76 = arith.addf %74, %75 : vector<32x128xf32>
    %77 = vector.broadcast %20 : vector<32x1xf32> to vector<32x128xf32>
    %78 = arith.addf %76, %77 : vector<32x128xf32>
    %cst_29 = arith.constant 0.000000e+00 : f32
    %79 = vector.broadcast %cst_29 : f32 to vector<32x128xf32>
    %80 = arith.maximumf %78, %79 : vector<32x128xf32>
    %c0_30 = arith.constant 0 : index
    %c0_31 = arith.constant 0 : index
    %c0_32 = arith.constant 0 : index
    %81 = vector.load %arg4[%c0_30, %c0_31, %c0_32] : memref<2x32x32xf32, #tpu.memory_space<vmem>>, vector<2x32x32xf32>
    %c0_33 = arith.constant 0 : index
    %c0_34 = arith.constant 0 : index
    %82 = vector.load %arg5[%c0_33, %c0_34] : memref<32x1xf32, #tpu.memory_space<vmem>>, vector<32x1xf32>
    %83 = vector.extract_strided_slice %81 {offsets = [0, 0, 0], sizes = [1, 32, 32], strides = [1, 1, 1]} : vector<2x32x32xf32> to vector<1x32x32xf32>
    %84 = vector.shape_cast %83 : vector<1x32x32xf32> to vector<32x32xf32>
    %85 = vector.extract_strided_slice %81 {offsets = [1, 0, 0], sizes = [1, 32, 32], strides = [1, 1, 1]} : vector<2x32x32xf32> to vector<1x32x32xf32>
    %86 = vector.shape_cast %85 : vector<1x32x32xf32> to vector<32x32xf32>
    %cst_35 = arith.constant dense<0.000000e+00> : vector<32x128xf32>
    %87 = tpu.matmul %84, %31, %cst_35 {dimension_numbers = #tpu.dot_dimension_numbers<[1], [0], [0], [1], [0, 0, 1, 1], [], []>} : vector<32x32xf32>, vector<32x128xf32>, vector<32x128xf32> -> vector<32x128xf32>
    %cst_36 = arith.constant dense<0.000000e+00> : vector<32x128xf32>
    %88 = tpu.matmul %86, %38, %cst_36 {dimension_numbers = #tpu.dot_dimension_numbers<[1], [0], [0], [1], [0, 0, 1, 1], [], []>} : vector<32x32xf32>, vector<32x128xf32>, vector<32x128xf32> -> vector<32x128xf32>
    %89 = arith.addf %87, %88 : vector<32x128xf32>
    %90 = vector.broadcast %82 : vector<32x1xf32> to vector<32x128xf32>
    %91 = arith.addf %89, %90 : vector<32x128xf32>
    %cst_37 = arith.constant 0.000000e+00 : f32
    %92 = vector.broadcast %cst_37 : f32 to vector<32x128xf32>
    %93 = arith.maximumf %91, %92 : vector<32x128xf32>
    %cst_38 = arith.constant dense<0.000000e+00> : vector<32x128xf32>
    %94 = tpu.matmul %84, %38, %cst_38 {dimension_numbers = #tpu.dot_dimension_numbers<[1], [0], [0], [1], [0, 0, 1, 1], [], []>} : vector<32x32xf32>, vector<32x128xf32>, vector<32x128xf32> -> vector<32x128xf32>
    %cst_39 = arith.constant dense<0.000000e+00> : vector<32x128xf32>
    %95 = tpu.matmul %86, %45, %cst_39 {dimension_numbers = #tpu.dot_dimension_numbers<[1], [0], [0], [1], [0, 0, 1, 1], [], []>} : vector<32x32xf32>, vector<32x128xf32>, vector<32x128xf32> -> vector<32x128xf32>
    %96 = arith.addf %94, %95 : vector<32x128xf32>
    %97 = vector.broadcast %82 : vector<32x1xf32> to vector<32x128xf32>
    %98 = arith.addf %96, %97 : vector<32x128xf32>
    %cst_40 = arith.constant 0.000000e+00 : f32
    %99 = vector.broadcast %cst_40 : f32 to vector<32x128xf32>
    %100 = arith.maximumf %98, %99 : vector<32x128xf32>
    %cst_41 = arith.constant dense<0.000000e+00> : vector<32x128xf32>
    %101 = tpu.matmul %84, %45, %cst_41 {dimension_numbers = #tpu.dot_dimension_numbers<[1], [0], [0], [1], [0, 0, 1, 1], [], []>} : vector<32x32xf32>, vector<32x128xf32>, vector<32x128xf32> -> vector<32x128xf32>
    %cst_42 = arith.constant dense<0.000000e+00> : vector<32x128xf32>
    %102 = tpu.matmul %86, %52, %cst_42 {dimension_numbers = #tpu.dot_dimension_numbers<[1], [0], [0], [1], [0, 0, 1, 1], [], []>} : vector<32x32xf32>, vector<32x128xf32>, vector<32x128xf32> -> vector<32x128xf32>
    %103 = arith.addf %101, %102 : vector<32x128xf32>
    %104 = vector.broadcast %82 : vector<32x1xf32> to vector<32x128xf32>
    %105 = arith.addf %103, %104 : vector<32x128xf32>
    %cst_43 = arith.constant 0.000000e+00 : f32
    %106 = vector.broadcast %cst_43 : f32 to vector<32x128xf32>
    %107 = arith.maximumf %105, %106 : vector<32x128xf32>
    %cst_44 = arith.constant dense<0.000000e+00> : vector<32x128xf32>
    %108 = tpu.matmul %84, %52, %cst_44 {dimension_numbers = #tpu.dot_dimension_numbers<[1], [0], [0], [1], [0, 0, 1, 1], [], []>} : vector<32x32xf32>, vector<32x128xf32>, vector<32x128xf32> -> vector<32x128xf32>
    %cst_45 = arith.constant dense<0.000000e+00> : vector<32x128xf32>
    %109 = tpu.matmul %86, %59, %cst_45 {dimension_numbers = #tpu.dot_dimension_numbers<[1], [0], [0], [1], [0, 0, 1, 1], [], []>} : vector<32x32xf32>, vector<32x128xf32>, vector<32x128xf32> -> vector<32x128xf32>
    %110 = arith.addf %108, %109 : vector<32x128xf32>
    %111 = vector.broadcast %82 : vector<32x1xf32> to vector<32x128xf32>
    %112 = arith.addf %110, %111 : vector<32x128xf32>
    %cst_46 = arith.constant 0.000000e+00 : f32
    %113 = vector.broadcast %cst_46 : f32 to vector<32x128xf32>
    %114 = arith.maximumf %112, %113 : vector<32x128xf32>
    %cst_47 = arith.constant dense<0.000000e+00> : vector<32x128xf32>
    %115 = tpu.matmul %84, %59, %cst_47 {dimension_numbers = #tpu.dot_dimension_numbers<[1], [0], [0], [1], [0, 0, 1, 1], [], []>} : vector<32x32xf32>, vector<32x128xf32>, vector<32x128xf32> -> vector<32x128xf32>
    %cst_48 = arith.constant dense<0.000000e+00> : vector<32x128xf32>
    %116 = tpu.matmul %86, %66, %cst_48 {dimension_numbers = #tpu.dot_dimension_numbers<[1], [0], [0], [1], [0, 0, 1, 1], [], []>} : vector<32x32xf32>, vector<32x128xf32>, vector<32x128xf32> -> vector<32x128xf32>
    %117 = arith.addf %115, %116 : vector<32x128xf32>
    %118 = vector.broadcast %82 : vector<32x1xf32> to vector<32x128xf32>
    %119 = arith.addf %117, %118 : vector<32x128xf32>
    %cst_49 = arith.constant 0.000000e+00 : f32
    %120 = vector.broadcast %cst_49 : f32 to vector<32x128xf32>
    %121 = arith.maximumf %119, %120 : vector<32x128xf32>
    %cst_50 = arith.constant dense<0.000000e+00> : vector<32x128xf32>
    %122 = tpu.matmul %84, %66, %cst_50 {dimension_numbers = #tpu.dot_dimension_numbers<[1], [0], [0], [1], [0, 0, 1, 1], [], []>} : vector<32x32xf32>, vector<32x128xf32>, vector<32x128xf32> -> vector<32x128xf32>
    %cst_51 = arith.constant dense<0.000000e+00> : vector<32x128xf32>
    %123 = tpu.matmul %86, %73, %cst_51 {dimension_numbers = #tpu.dot_dimension_numbers<[1], [0], [0], [1], [0, 0, 1, 1], [], []>} : vector<32x32xf32>, vector<32x128xf32>, vector<32x128xf32> -> vector<32x128xf32>
    %124 = arith.addf %122, %123 : vector<32x128xf32>
    %125 = vector.broadcast %82 : vector<32x1xf32> to vector<32x128xf32>
    %126 = arith.addf %124, %125 : vector<32x128xf32>
    %cst_52 = arith.constant 0.000000e+00 : f32
    %127 = vector.broadcast %cst_52 : f32 to vector<32x128xf32>
    %128 = arith.maximumf %126, %127 : vector<32x128xf32>
    %cst_53 = arith.constant dense<0.000000e+00> : vector<32x128xf32>
    %129 = tpu.matmul %84, %73, %cst_53 {dimension_numbers = #tpu.dot_dimension_numbers<[1], [0], [0], [1], [0, 0, 1, 1], [], []>} : vector<32x32xf32>, vector<32x128xf32>, vector<32x128xf32> -> vector<32x128xf32>
    %cst_54 = arith.constant dense<0.000000e+00> : vector<32x128xf32>
    %130 = tpu.matmul %86, %80, %cst_54 {dimension_numbers = #tpu.dot_dimension_numbers<[1], [0], [0], [1], [0, 0, 1, 1], [], []>} : vector<32x32xf32>, vector<32x128xf32>, vector<32x128xf32> -> vector<32x128xf32>
    %131 = arith.addf %129, %130 : vector<32x128xf32>
    %132 = vector.broadcast %82 : vector<32x1xf32> to vector<32x128xf32>
    %133 = arith.addf %131, %132 : vector<32x128xf32>
    %cst_55 = arith.constant 0.000000e+00 : f32
    %134 = vector.broadcast %cst_55 : f32 to vector<32x128xf32>
    %135 = arith.maximumf %133, %134 : vector<32x128xf32>
    %c0_56 = arith.constant 0 : index
    %c0_57 = arith.constant 0 : index
    %c0_58 = arith.constant 0 : index
    %136 = vector.load %arg6[%c0_56, %c0_57, %c0_58] : memref<7x32x32xf32, #tpu.memory_space<vmem>>, vector<7x32x32xf32>
    %c0_59 = arith.constant 0 : index
    %c0_60 = arith.constant 0 : index
    %137 = vector.load %arg7[%c0_59, %c0_60] : memref<32x1xf32, #tpu.memory_space<vmem>>, vector<32x1xf32>
    %138 = vector.extract_strided_slice %136 {offsets = [0, 0, 0], sizes = [1, 32, 32], strides = [1, 1, 1]} : vector<7x32x32xf32> to vector<1x32x32xf32>
    %139 = vector.shape_cast %138 : vector<1x32x32xf32> to vector<32x32xf32>
    %cst_61 = arith.constant dense<0.000000e+00> : vector<32x128xf32>
    %140 = tpu.matmul %139, %93, %cst_61 {dimension_numbers = #tpu.dot_dimension_numbers<[1], [0], [0], [1], [0, 0, 1, 1], [], []>} : vector<32x32xf32>, vector<32x128xf32>, vector<32x128xf32> -> vector<32x128xf32>
    %141 = vector.broadcast %137 : vector<32x1xf32> to vector<32x128xf32>
    %142 = arith.addf %141, %140 : vector<32x128xf32>
    %143 = vector.extract_strided_slice %136 {offsets = [1, 0, 0], sizes = [1, 32, 32], strides = [1, 1, 1]} : vector<7x32x32xf32> to vector<1x32x32xf32>
    %144 = vector.shape_cast %143 : vector<1x32x32xf32> to vector<32x32xf32>
    %cst_62 = arith.constant dense<0.000000e+00> : vector<32x128xf32>
    %145 = tpu.matmul %144, %100, %cst_62 {dimension_numbers = #tpu.dot_dimension_numbers<[1], [0], [0], [1], [0, 0, 1, 1], [], []>} : vector<32x32xf32>, vector<32x128xf32>, vector<32x128xf32> -> vector<32x128xf32>
    %146 = arith.addf %142, %145 : vector<32x128xf32>
    %147 = vector.extract_strided_slice %136 {offsets = [2, 0, 0], sizes = [1, 32, 32], strides = [1, 1, 1]} : vector<7x32x32xf32> to vector<1x32x32xf32>
    %148 = vector.shape_cast %147 : vector<1x32x32xf32> to vector<32x32xf32>
    %cst_63 = arith.constant dense<0.000000e+00> : vector<32x128xf32>
    %149 = tpu.matmul %148, %107, %cst_63 {dimension_numbers = #tpu.dot_dimension_numbers<[1], [0], [0], [1], [0, 0, 1, 1], [], []>} : vector<32x32xf32>, vector<32x128xf32>, vector<32x128xf32> -> vector<32x128xf32>
    %150 = arith.addf %146, %149 : vector<32x128xf32>
    %151 = vector.extract_strided_slice %136 {offsets = [3, 0, 0], sizes = [1, 32, 32], strides = [1, 1, 1]} : vector<7x32x32xf32> to vector<1x32x32xf32>
    %152 = vector.shape_cast %151 : vector<1x32x32xf32> to vector<32x32xf32>
    %cst_64 = arith.constant dense<0.000000e+00> : vector<32x128xf32>
    %153 = tpu.matmul %152, %114, %cst_64 {dimension_numbers = #tpu.dot_dimension_numbers<[1], [0], [0], [1], [0, 0, 1, 1], [], []>} : vector<32x32xf32>, vector<32x128xf32>, vector<32x128xf32> -> vector<32x128xf32>
    %154 = arith.addf %150, %153 : vector<32x128xf32>
    %155 = vector.extract_strided_slice %136 {offsets = [4, 0, 0], sizes = [1, 32, 32], strides = [1, 1, 1]} : vector<7x32x32xf32> to vector<1x32x32xf32>
    %156 = vector.shape_cast %155 : vector<1x32x32xf32> to vector<32x32xf32>
    %cst_65 = arith.constant dense<0.000000e+00> : vector<32x128xf32>
    %157 = tpu.matmul %156, %121, %cst_65 {dimension_numbers = #tpu.dot_dimension_numbers<[1], [0], [0], [1], [0, 0, 1, 1], [], []>} : vector<32x32xf32>, vector<32x128xf32>, vector<32x128xf32> -> vector<32x128xf32>
    %158 = arith.addf %154, %157 : vector<32x128xf32>
    %159 = vector.extract_strided_slice %136 {offsets = [5, 0, 0], sizes = [1, 32, 32], strides = [1, 1, 1]} : vector<7x32x32xf32> to vector<1x32x32xf32>
    %160 = vector.shape_cast %159 : vector<1x32x32xf32> to vector<32x32xf32>
    %cst_66 = arith.constant dense<0.000000e+00> : vector<32x128xf32>
    %161 = tpu.matmul %160, %128, %cst_66 {dimension_numbers = #tpu.dot_dimension_numbers<[1], [0], [0], [1], [0, 0, 1, 1], [], []>} : vector<32x32xf32>, vector<32x128xf32>, vector<32x128xf32> -> vector<32x128xf32>
    %162 = arith.addf %158, %161 : vector<32x128xf32>
    %163 = vector.extract_strided_slice %136 {offsets = [6, 0, 0], sizes = [1, 32, 32], strides = [1, 1, 1]} : vector<7x32x32xf32> to vector<1x32x32xf32>
    %164 = vector.shape_cast %163 : vector<1x32x32xf32> to vector<32x32xf32>
    %cst_67 = arith.constant dense<0.000000e+00> : vector<32x128xf32>
    %165 = tpu.matmul %164, %135, %cst_67 {dimension_numbers = #tpu.dot_dimension_numbers<[1], [0], [0], [1], [0, 0, 1, 1], [], []>} : vector<32x32xf32>, vector<32x128xf32>, vector<32x128xf32> -> vector<32x128xf32>
    %166 = arith.addf %162, %165 : vector<32x128xf32>
    %c0_68 = arith.constant 0 : index
    %c0_69 = arith.constant 0 : index
    %167 = vector.load %arg8[%c0_68, %c0_69] : memref<32x128xf32, #tpu.memory_space<vmem>>, vector<32x128xf32>
    tpu.vector_store %arg8[%c0_68, %c0_69], %166 {strides = array<i32>} : memref<32x128xf32, #tpu.memory_space<vmem>>, vector<32x128xf32>,
    return
  }
  func.func @transform_0(%arg0: i32) -> (i32, i32, i32) {
    %c0_i32 = arith.constant 0 : i32
    %c0_i32_0 = arith.constant 0 : i32
    %c0_i32_1 = arith.constant 0 : i32
    return %c0_i32, %c0_i32_0, %arg0 : i32, i32, i32
  }
  func.func @transform_1(%arg0: i32) -> (i32, i32, i32) {
    %c0_i32 = arith.constant 0 : i32
    %c0_i32_0 = arith.constant 0 : i32
    %c0_i32_1 = arith.constant 0 : i32
    %c0_i32_2 = arith.constant 0 : i32
    return %c0_i32, %c0_i32_0, %c0_i32_1 : i32, i32, i32
  }
  func.func @transform_2(%arg0: i32) -> (i32, i32) {
    %c0_i32 = arith.constant 0 : i32
    %c0_i32_0 = arith.constant 0 : i32
    %c0_i32_1 = arith.constant 0 : i32
    return %c0_i32, %c0_i32_0 : i32, i32
  }
  func.func @transform_3(%arg0: i32) -> (i32, i32, i32) {
    %c0_i32 = arith.constant 0 : i32
    %c0_i32_0 = arith.constant 0 : i32
    %c0_i32_1 = arith.constant 0 : i32
    %c0_i32_2 = arith.constant 0 : i32
    return %c0_i32, %c0_i32_0, %c0_i32_1 : i32, i32, i32
  }
  func.func @transform_4(%arg0: i32) -> (i32, i32) {
    %c0_i32 = arith.constant 0 : i32
    %c0_i32_0 = arith.constant 0 : i32
    %c0_i32_1 = arith.constant 0 : i32
    return %c0_i32, %c0_i32_0 : i32, i32
  }
  func.func @transform_5(%arg0: i32) -> (i32, i32, i32) {
    %c0_i32 = arith.constant 0 : i32
    %c0_i32_0 = arith.constant 0 : i32
    %c0_i32_1 = arith.constant 0 : i32
    %c0_i32_2 = arith.constant 0 : i32
    return %c0_i32, %c0_i32_0, %c0_i32_1 : i32, i32, i32
  }
  func.func @transform_6(%arg0: i32) -> (i32, i32) {
    %c0_i32 = arith.constant 0 : i32
    %c0_i32_0 = arith.constant 0 : i32
    %c0_i32_1 = arith.constant 0 : i32
    return %c0_i32, %c0_i32_0 : i32, i32
  }
  func.func @transform_7(%arg0: i32) -> (i32, i32) {
    %c0_i32 = arith.constant 0 : i32
    %c0_i32_0 = arith.constant 0 : i32
    return %c0_i32, %arg0 : i32, i32
  }
}

</mosaic_0001>

<bundles_post_ra>
// kernel: tpu_custom_call.1
= control target key start
LH: loop header
LB: loop body
LE: loop exit
PB: predicated region body
PF: predicated region fallthrough
CT: control target
= control target key end

     0   :  { %12 = vsyncpa [#allocation3], 0  ;;  %s5471_s0 = inlined_call_operand.vmem [shape: f32[9,4,128], index: 0, kind: input, shape index: {}]   ;;  %s5472_s1 = inlined_call_operand.vmem [shape: f32[2,32,4], index: 1, kind: input, shape index: {}]   ;;  %s5473_s2 = inlined_call_operand.vmem [shape: f32[32,1], index: 2, kind: input, shape index: {}]   ;;  %s5474_s3 = inlined_call_operand.vmem [shape: f32[2,32,32], index: 3, kind: input, shape index: {}]   ;;  %s5475_s4 = inlined_call_operand.vmem [shape: f32[32,1], index: 4, kind: input, shape index: {}]   ;;  %s5476_s5 = inlined_call_operand.hbm [shape: f32[7,32,32], index: 5, kind: input, shape index: {}]   ;;  %s5477_s6 = inlined_call_operand.vmem [shape: f32[32,1], index: 6, kind: input, shape index: {}]   ;;  %s5478_s7 = inlined_call_operand.hbm [shape: f32[32,128], index: 7, kind: output, shape index: {}]  }
   0x1   :  { %13 = vsyncpa [#allocation4], 0  ;;  %s4789_s24 = smov [#allocation2]   ;;  %s4741_s28 = scalar_lea.hbm %s5476_s5, 3584 }
   0x2   :  { %s29_s25 = sshll.u32 %s4789_s24, 4  ;;  %p4742_p0 = scmp.ne.s32.totalorder %s5476_s5, %s4741_s28  ;;  %s30_s25 = int_to_ptr.vmem [resolvable:$true] %s29_s25 }
   0x3   :  { %p4745_p1 = scmp.lt.u32.totalorder %s4741_s28, %s5476_s5 }
   0x5   :  { %p4747_p2 = pnand %p4745_p1, %p4742_p0 }
   0x7   :  { %4750 = shalt.err (!%p4747_p2)
}
   0x8   :  { %s4751_s10 = scalar_lea.vmem %s30_s25, 3584  ;;  %p4756_p4 = scmp.lt.s32.totalorder %s30_s25, %s30_s25 }
   0x9   :  { %p4752_p3 = scmp.ne.s32.totalorder %s30_s25, %s4751_s10  ;;  %p4757_p5 = scmp.lt.s32.totalorder %s4751_s10, %s4751_s10 }
   0xb   :  { %p4758_p6 = por %p4757_p5, %p4756_p4 }
   0xd   :  { %p4759_p7 = pnand %p4758_p6, %p4752_p3 }
   0xf   :  { %4762 = shalt.err (!%p4759_p7)
}
  0x10   :  { %s4790_s11 = smov 128   ;;  %s4791_s12 = smov 8  }
  0x11   :  { %35 = dma.hbm_to_vmem [thread:$0]  %s5476_s5, 3584, %s30_s25, [#allocation3], %s4790_s11, %s4790_s11, %s4791_s12  }
  0x12   :  { %4785 = dma.done.wait [#allocation3], 3584  }
  0x13   :  { %4786 = vsyncadd [#allocation3], 4294963712  ;;  %v4792_v0 = vmov 0   ;;  %vm75_vm0 = vcmask 1043456   ;;  %vm62_vm1 = vcmask 31744   ;;  %v4862_v3 = vld [vmem:[%s5472_s1 + $0x20] sm:$0xff] }
  0x14   :  { %4739 = vset.pattern.permute.xlu0 %v4792_v0  ;;  %4740 = vset.pattern.permute.xlu1 %v4792_v0  ;;  %v4852_v1 = vld [vmem:[%s5471_s0 + $0x4] sm:$0xf]  ;;  %v4857_v2 = vld [vmem:[%s5471_s0 + $0x10] sm:$0xf]  ;;  %v4876_v5 = vld [vmem:[%s5472_s1 + $0x28] sm:$0xff]  ;;  %vm1571_vm2 = vcmask 261120  }
  0x15   :  { %4054 = vmatprep.subr.msk.mxu0 %vm75_vm0, %v4852_v1  ;;  %4644 = vmatprep.subr.msk.mxu1 %vm75_vm0, %v4857_v2  ;;  %v4871_v4 = vld [vmem:[%s5472_s1 + $0x30] sm:$0xff]  ;;  %v41_v6 = vld [vmem:[%s5471_s0] sm:$0xf]  ;;  %v4888_v7 = vld [vmem:[%s5472_s1 + $0x38] sm:$0xff] }
  0x16   :  { %4055 = vmatpush3.msk.msra.mxu0 %vm75_vm0, %v4852_v1  ;;  %4056 = vmatprep.mubr.msk.f32.mxu0 %vm62_vm1, %v4862_v3  ;;  %v4897_v8 = vld [vmem:[%s5471_s0 + $0xc] sm:$0xf]  ;;  %v4905_v9 = vld [vmem:[%s5472_s1] sm:$0xff]  ;;  %v4913_v10 = vld [vmem:[%s5471_s0 + $0x8] sm:$0xf] }
  0x17   :  { %4645 = vmatpush3.msk.msra.mxu1 %vm75_vm0, %v4857_v2  ;;  %4107 = vmatprep.mubr.msk.f32.mxu1 %vm62_vm1, %v4871_v4  ;;  %v4922_v11 = vld [vmem:[%s5472_s1 + $0x8] sm:$0xff]  ;;  %v4931_v12 = vld [vmem:[%s5472_s1 + $0x10] sm:$0xff]  ;;  %v4936_v13 = vld [vmem:[%s5471_s0 + $0x18] sm:$0xf] }
  0x18   :  { %4057 = vmatmul.mubr.msk.f32.vlgmr.msra.gmra.mrb[0].mxu0 %vm62_vm1, %v4876_v5  ;;  %4062 = vmatprep.subr.msk.mxu0 %vm75_vm0, %v41_v6  ;;  %v58_v14 = vld [vmem:[%s5473_s2] sm:$0xff]  ;;  %v4952_v15 = vld [vmem:[%s5471_s0 + $0x14] sm:$0xf]  ;;  %v4959_v16 = vld [vmem:[%s5472_s1 + $0x18] sm:$0xff] }
  0x19   :  { %4108 = vmatmul.mubr.msk.f32.vlgmr.msra.gmra.mrb[0].mxu1 %vm62_vm1, %v4888_v7  ;;  %4063 = vmatpush3.msk.msra.mxu0 %vm75_vm0, %v41_v6  ;;  %v60_v17 = vld [vmem:[%s5473_s2 + $0x10] sm:$0xff]  ;;  %v59_v18 = vld [vmem:[%s5473_s2 + $0x8] sm:$0xff]  ;;  %v49_v19 = vld [vmem:[%s5471_s0 + $0x20] sm:$0xf] }
  0x1a   :  { %4110 = vmatprep.subr.msk.mxu1 %vm75_vm0, %v4897_v8  ;;  %4059 = vmatprep.mubr.msk.f32.mxu0 %vm62_vm1, %v4871_v4  ;;  %v61_v20 = vld [vmem:[%s5473_s2 + $0x18] sm:$0xff]  ;;  %v1567_v21 = vld [vmem:[%s5475_s4] sm:$0xff]  ;;  %v1568_v22 = vld [vmem:[%s5475_s4 + $0x8] sm:$0xff] }
  0x1b   :  { %4111 = vmatpush3.msk.msra.mxu1 %vm75_vm0, %v4897_v8  ;;  %4112 = vmatprep.mubr.msk.f32.mxu1 %vm62_vm1, %v4905_v9  ;;  %v1569_v23 = vld [vmem:[%s5475_s4 + $0x10] sm:$0xff]  ;;  %v48_v24 = vld [vmem:[%s5471_s0 + $0x1c] sm:$0xf]  ;;  %v2890_v26 = vld [vmem:[%s5477_s6] sm:$0xff] }
  0x1c   :  { %4060 = vmatmul.mubr.msk.f32.gmra.mrb[2].mxu0 %vm62_vm1, %v4888_v7  ;;  %4070 = vmatprep.subr.msk.mxu0 %vm75_vm0, %v4913_v10  ;;  %v1570_v25 = vld [vmem:[%s5475_s4 + $0x18] sm:$0xff]  ;;  %v2891_v27 = vld [vmem:[%s5477_s6 + $0x8] sm:$0xff]  ;;  %v2892_v28 = vld [vmem:[%s5477_s6 + $0x10] sm:$0xff] }
  0x1d   :  { %4113 = vmatmul.mubr.msk.f32.vlgmr.msra.gmra.mrb[2].mxu1 %vm62_vm1, %v4922_v11  ;;  %4064 = vmatprep.mubr.msk.f32.mxu0 %vm62_vm1, %v4905_v9  ;;  %v2893_v29 = vld [vmem:[%s5477_s6 + $0x18] sm:$0xff]  ;;  %v5155_v30 = vld [vmem:[%s5474_s3 + $0x20] sm:$0xff] }
  0x1e   :  { %4115 = vmatprep.mubr.msk.f32.mxu1 %vm62_vm1, %v4931_v12  ;;  %4134 = vmatprep.subr.msk.mxu1 %vm75_vm0, %v4936_v13 }
  0x1f   :  { %4135 = vmatpush3.msk.msra.mxu1 %vm75_vm0, %v4936_v13  ;;  %266 = vperm.xlu0 %4739, %v58_v14  }
  0x20   :  { %4065 = vmatmul.mubr.msk.f32.vlgmr.msra.gmra.mrb[0].mxu0 %vm62_vm1, %v4922_v11  ;;  %4142 = vmatprep.subr.msk.mxu1 %vm75_vm0, %v4952_v15 }
  0x21   :  { %4116 = vmatmul.mubr.msk.f32.gmra.mrb[0].mxu1 %vm62_vm1, %v4959_v16  ;;  %4071 = vmatpush3.msk.msra.mxu0 %vm75_vm0, %v4913_v10 }
  0x22   :  { %4067 = vmatprep.mubr.msk.f32.mxu0 %vm62_vm1, %v4931_v12  ;;  %4136 = vmatprep.mubr.msk.f32.mxu1 %vm62_vm1, %v4862_v3 }
  0x23   :  { %4078 = vmatprep.subr.msk.mxu0 %vm75_vm0, %v4852_v1  ;;  %276 = vperm.xlu1 %4740, %v60_v17  }
  0x24   :  { %4068 = vmatmul.mubr.msk.f32.gmra.mrb[2].mxu0 %vm62_vm1, %v4959_v16  ;;  %271 = vperm.xlu0 %4739, %v59_v18  }
  0x25   :  { %4137 = vmatmul.mubr.msk.f32.vlgmr.msra.gmra.mrb[4].mxu1 %vm62_vm1, %v4876_v5  ;;  %4072 = vmatprep.mubr.msk.f32.mxu0 %vm62_vm1, %v4862_v3 }
  0x26   :  { %4139 = vmatprep.mubr.msk.f32.mxu1 %vm62_vm1, %v4871_v4  ;;  %4143 = vmatpush3.msk.msra.mxu1 %vm75_vm0, %v4952_v15 }
  0x27   :  { %4166 = vmatprep.subr.msk.mxu1 %vm75_vm0, %v49_v19  ;;  %281 = vperm.xlu1 %4740, %v61_v20  }
  0x28   :  { %4073 = vmatmul.mubr.msk.f32.vlgmr.msra.gmra.mrb[4].mxu0 %vm62_vm1, %v4876_v5  ;;  %1768 = vperm.xlu0 %4739, %v1567_v21  }
  0x29   :  { %4140 = vmatmul.mubr.msk.f32.gmra.mrb[6].mxu1 %vm62_vm1, %v4888_v7  ;;  %4079 = vmatpush3.msk.msra.mxu0 %vm75_vm0, %v4852_v1 }
  0x2a   :  { %4075 = vmatprep.mubr.msk.f32.mxu0 %vm62_vm1, %v4871_v4  ;;  %4144 = vmatprep.mubr.msk.f32.mxu1 %vm62_vm1, %v4905_v9 }
  0x2b   :  { %4086 = vmatprep.subr.msk.mxu0 %vm75_vm0, %v4897_v8  ;;  %1773 = vperm.xlu1 %4740, %v1568_v22  }
  0x2c   :  { %4076 = vmatmul.mubr.msk.f32.gmra.mrb[6].mxu0 %vm62_vm1, %v4888_v7  ;;  %1778 = vperm.xlu0 %4739, %v1569_v23   ;;  %v5206_v23 = vld [vmem:[%s5474_s3 + $0x28] sm:$0xff] }
  0x2d   :  { %4145 = vmatmul.mubr.msk.f32.vlgmr.msra.gmra.mrb[4].mxu1 %vm62_vm1, %v4922_v11  ;;  %4080 = vmatprep.mubr.msk.f32.mxu0 %vm62_vm1, %v4905_v9 }
  0x2e   :  { %4147 = vmatprep.mubr.msk.f32.mxu1 %vm62_vm1, %v4931_v12  ;;  %4167 = vmatpush3.msk.msra.mxu1 %vm75_vm0, %v49_v19 }
  0x2f   :  { %4174 = vmatprep.subr.msk.mxu1 %vm75_vm0, %v48_v24  ;;  %1783 = vperm.xlu1 %4740, %v1570_v25  }
  0x30   :  { %4081 = vmatmul.mubr.msk.f32.vlgmr.msra.gmra.mrb[4].mxu0 %vm62_vm1, %v4922_v11  ;;  %2993 = vperm.xlu0 %4739, %v2890_v26   ;;  %v5212_v26 = vld [vmem:[%s5474_s3 + $0x30] sm:$0xff] }
  0x31   :  { %4148 = vmatmul.mubr.msk.f32.gmra.mrb[6].mxu1 %vm62_vm1, %v4959_v16  ;;  %4087 = vmatpush3.msk.msra.mxu0 %vm75_vm0, %v4897_v8 }
  0x32   :  { %4083 = vmatprep.mubr.msk.f32.mxu0 %vm62_vm1, %v4931_v12  ;;  %4168 = vmatprep.mubr.msk.f32.mxu1 %vm62_vm1, %v4862_v3 }
  0x33   :  { %4094 = vmatprep.subr.msk.mxu0 %vm75_vm0, %v4913_v10  ;;  %2998 = vperm.xlu1 %4740, %v2891_v27  }
  0x34   :  { %4084 = vmatmul.mubr.msk.f32.gmra.mrb[6].mxu0 %vm62_vm1, %v4959_v16  ;;  %3003 = vperm.xlu0 %4739, %v2892_v28  }
  0x35   :  { %4169 = vmatmul.mubr.msk.f32.vlgmr.msra.gmra.mrb[8].mxu1 %vm62_vm1, %v4876_v5  ;;  %4088 = vmatprep.mubr.msk.f32.mxu0 %vm62_vm1, %v4862_v3 }
  0x36   :  { %4171 = vmatprep.mubr.msk.f32.mxu1 %vm62_vm1, %v4871_v4  ;;  %4175 = vmatpush3.msk.msra.mxu1 %vm75_vm0, %v48_v24 }
  0x37   :  { %3008 = vperm.xlu1 %4740, %v2893_v29  }
  0x38   :  { %4089 = vmatmul.mubr.msk.f32.vlgmr.msra.gmra.mrb[8].mxu0 %vm62_vm1, %v4876_v5 }
  0x39   :  { %4172 = vmatmul.mubr.msk.f32.gmra.mrb[10].mxu1 %vm62_vm1, %v4888_v7  ;;  %4095 = vmatpush3.msk.msra.mxu0 %vm75_vm0, %v4913_v10 }
  0x3a   :  { %4091 = vmatprep.mubr.msk.f32.mxu0 %vm62_vm1, %v4871_v4  ;;  %4176 = vmatprep.mubr.msk.f32.mxu1 %vm62_vm1, %v4905_v9 }
  0x3b   :  { %4102 = vmatprep.subr.msk.mxu0 %vm75_vm0, %v4857_v2 }
  0x3c   :  { %4092 = vmatmul.mubr.msk.f32.gmra.mrb[10].mxu0 %vm62_vm1, %v4888_v7 }
  0x3d   :  { %4177 = vmatmul.mubr.msk.f32.vlgmr.msra.gmra.mrb[8].mxu1 %vm62_vm1, %v4922_v11  ;;  %4096 = vmatprep.mubr.msk.f32.mxu0 %vm62_vm1, %v4905_v9 }
  0x3e   :  { %4179 = vmatprep.mubr.msk.f32.mxu1 %vm62_vm1, %v4931_v12 }
  0x40   :  { %4097 = vmatmul.mubr.msk.f32.vlgmr.msra.gmra.mrb[8].mxu0 %vm62_vm1, %v4922_v11 }
  0x41   :  { %4180 = vmatmul.mubr.msk.f32.gmra.mrb[10].mxu1 %vm62_vm1, %v4959_v16  ;;  %4103 = vmatpush3.msk.msra.mxu0 %vm75_vm0, %v4857_v2 }
  0x42   :  { %4099 = vmatprep.mubr.msk.f32.mxu0 %vm62_vm1, %v4931_v12  ;;  %4118 = vmatprep.subr.msk.mxu0 %vm75_vm0, %v4952_v15 }
  0x43   :  { %4218 = vmatprep.mubr.msk.f32.mxu1 %vm1571_vm2, %v5155_v30 }
  0x44   :  { %4100 = vmatmul.mubr.msk.f32.gmra.mrb[10].mxu0 %vm62_vm1, %v4959_v16 }
  0x45   :  { %4104 = vmatprep.mubr.msk.f32.mxu0 %vm62_vm1, %v4862_v3 }
  0x48   :  { %4105 = vmatmul.mubr.msk.f32.vlgmr.msra.gmra.mrb[12].mxu0 %vm62_vm1, %v4876_v5 }
  0x49   :  { %4119 = vmatpush3.msk.msra.mxu0 %vm75_vm0, %v4952_v15  ;;  %4120 = vmatprep.mubr.msk.f32.mxu0 %vm62_vm1, %v4862_v3 }
  0x4a   :  { %4126 = vmatprep.subr.msk.mxu0 %vm75_vm0, %v4857_v2 }
  0x4c   :  { %4121 = vmatmul.mubr.msk.f32.vlgmr.msra.gmra.mrb[14].mxu0 %vm62_vm1, %v4876_v5 }
  0x4d   :  { %4127 = vmatpush3.msk.msra.mxu0 %vm75_vm0, %v4857_v2  ;;  %4123 = vmatprep.mubr.msk.f32.mxu0 %vm62_vm1, %v4871_v4 }
  0x4e   :  { %4150 = vmatprep.subr.msk.mxu0 %vm75_vm0, %v48_v24 }
  0x50   :  { %4124 = vmatmul.mubr.msk.f32.gmra.mrb[16].mxu0 %vm62_vm1, %v4888_v7 }
  0x51   :  { %4128 = vmatprep.mubr.msk.f32.mxu0 %vm62_vm1, %v4905_v9 }
  0x54   :  { %4129 = vmatmul.mubr.msk.f32.vlgmr.msra.gmra.mrb[14].mxu0 %vm62_vm1, %v4922_v11 }
  0x55   :  { %4151 = vmatpush3.msk.msra.mxu0 %vm75_vm0, %v48_v24  ;;  %4131 = vmatprep.mubr.msk.f32.mxu0 %vm62_vm1, %v4931_v12 }
  0x56   :  { %4158 = vmatprep.subr.msk.mxu0 %vm75_vm0, %v4936_v13 }
  0x58   :  { %4132 = vmatmul.mubr.msk.f32.gmra.mrb[16].mxu0 %vm62_vm1, %v4959_v16 }
  0x59   :  { %4152 = vmatprep.mubr.msk.f32.mxu0 %vm62_vm1, %v4862_v3 }
  0x5c   :  { %4153 = vmatmul.mubr.msk.f32.vlgmr.msra.gmra.mrb[18].mxu0 %vm62_vm1, %v4876_v5 }
  0x5d   :  { %4159 = vmatpush3.msk.msra.mxu0 %vm75_vm0, %v4936_v13  ;;  %4155 = vmatprep.mubr.msk.f32.mxu0 %vm62_vm1, %v4871_v4 }
  0x60   :  { %4156 = vmatmul.mubr.msk.f32.gmra.mrb[20].mxu0 %vm62_vm1, %v4888_v7 }
  0x61   :  { %4160 = vmatprep.mubr.msk.f32.mxu0 %vm62_vm1, %v4905_v9 }
  0x64   :  { %4161 = vmatmul.mubr.msk.f32.vlgmr.msra.gmra.mrb[18].mxu0 %vm62_vm1, %v4922_v11 }
  0x65   :  { %4163 = vmatprep.mubr.msk.f32.mxu0 %vm62_vm1, %v4931_v12 }
  0x68   :  { %4164 = vmatmul.mubr.msk.f32.gmra.mrb[20].mxu0 %vm62_vm1, %v4959_v16 }
  0x69   :  { %4190 = vmatprep.mubr.msk.f32.mxu0 %vm1571_vm2, %v5155_v30 }
  0x9e   :  { %v5161_v31 = vpop.permute.xlu0 %266 }
  0xa2   :  { %v5163_v32 = vpop.permute.xlu1 %276 }
  0xa3   :  { %v5167_v34 = vpop.permute.xlu0 %271 }
  0xa6   :  { %v5171_v37 = vpop.permute.xlu1 %281 }
  0xf0   :  { %v5165_v33 = vpop.f32.mrb[2].mxu1 }
  0xf1   :  { %v5169_v35 = vpop.f32.mrb[3].mxu1 }
  0xf3   :  { %v4066_v36 = vpop.f32.mrb[0].mxu0 }
  0xf4   :  { %v285_v38 = vadd.f32 %v4066_v36, %v5167_v34  ;;  %v245_v39 = vpop.f32.mrb[1].mxu0  ;;  %v4117_v40 = vpop.f32.mrb[0].mxu1 }
  0xf5   :  { %v284_v41 = vadd.f32 %v5161_v31, %v245_v39  ;;  %v830_v42 = vadd.f32 %v4117_v40, %v5171_v37  ;;  %v818_v43 = vpop.f32.mrb[1].mxu1 }
  0xf6   :  { %v289_v44 = vmax.f32 %v285_v38, 0.0  ;;  %v829_v45 = vadd.f32 %v818_v43, %v5163_v32 }
  0xf7   :  { %v288_v46 = vmax.f32 %v284_v41, 0.0  ;;  %v4069_v47 = vpop.f32.mrb[2].mxu0  ;;  %v834_v48 = vmax.f32 %v830_v42, 0.0  ;;  %v5223_v41 = vld [vmem:[%s5474_s3 + $0x38] sm:$0xff] }
  0xf8   :  { %v287_v49 = vadd.f32 %v4069_v47, %v5171_v37  ;;  %v255_v50 = vpop.f32.mrb[3].mxu0  ;;  %v833_v51 = vmax.f32 %v829_v45, 0.0  ;;  %v5231_v45 = vld [vmem:[%s5474_s3] sm:$0xff] }
  0xf9   :  { %v4484_v52 = vpack.c.bf16 %v289_v44, %v288_v46  ;;  %v286_v53 = vadd.f32 %v5163_v32, %v255_v50 }
  0xfa   :  { %v291_v54 = vmax.f32 %v287_v49, 0.0  ;;  %v5179_v55 = vpack.c.bf16 %v834_v48, %v833_v51 }
  0xfb   :  { %v290_v56 = vmax.f32 %v286_v53, 0.0 }
  0xfd   :  { %v5181_v57 = vpack.c.bf16 %v291_v54, %v290_v56  ;;  %v5245_v56 = vld [vmem:[%s5474_s3 + $0x8] sm:$0xff] }
 0x100   :  { %v4146_v58 = vpop.f32.mrb[4].mxu1 }
 0x101   :  { %v1190_v59 = vadd.f32 %v4146_v58, %v5167_v34  ;;  %v1170_v60 = vpop.f32.mrb[5].mxu1 }
 0x102   :  { %v1189_v61 = vadd.f32 %v1170_v60, %v5161_v31  ;;  %v5251_v60 = vld [vmem:[%s5474_s3 + $0x10] sm:$0xff] }
 0x103   :  { %v4082_v62 = vpop.f32.mrb[4].mxu0  ;;  %v1194_v63 = vmax.f32 %v1190_v59, 0.0 }
 0x104   :  { %v466_v0 = vadd.f32 %v4082_v62, %v5167_v34  ;;  %v446_v1 = vpop.f32.mrb[5].mxu0  ;;  %v1193_v2 = vmax.f32 %v1189_v61, 0.0  ;;  %v4149_v3 = vpop.f32.mrb[6].mxu1 }
 0x105   :  { %v465_v4 = vadd.f32 %v446_v1, %v5161_v31  ;;  %v1192_v5 = vadd.f32 %v4149_v3, %v5171_v37  ;;  %v1180_v6 = vpop.f32.mrb[7].mxu1 }
 0x106   :  { %v470_v7 = vmax.f32 %v466_v0, 0.0  ;;  %v5188_v8 = vpack.c.bf16 %v1194_v63, %v1193_v2  ;;  %v1191_v9 = vadd.f32 %v1180_v6, %v5163_v32  ;;  %v5263_v2 = vld [vmem:[%s5474_s3 + $0x18] sm:$0xff]  ;;  %s4793_s3 = smov [#allocation5]  }
 0x107   :  { %v469_v10 = vmax.f32 %v465_v4, 0.0  ;;  %v4085_v11 = vpop.f32.mrb[6].mxu0  ;;  %v1196_v12 = vmax.f32 %v1192_v5, 0.0  ;;  %s3630_s16 = sshll.u32 %s4793_s3, 4  ;;  %s3631_s16 = int_to_ptr.vmem [resolvable:$true] %s3630_s16 }
 0x108   :  { %v468_v13 = vadd.f32 %v4085_v11, %v5171_v37  ;;  %v456_v14 = vpop.f32.mrb[7].mxu0  ;;  %v1195_v15 = vmax.f32 %v1191_v9, 0.0  ;;  %s4763_s17 = scalar_lea.vmem %s3631_s16, 512  ;;  %p4768_p9 = scmp.lt.s32.totalorder %s3631_s16, %s3631_s16 }
 0x109   :  { %v5192_v16 = vpack.c.bf16 %v470_v7, %v469_v10  ;;  %v467_v17 = vadd.f32 %v456_v14, %v5163_v32  ;;  %p4764_p8 = scmp.ne.s32.totalorder %s3631_s16, %s4763_s17  ;;  %p4769_p10 = scmp.lt.s32.totalorder %s4763_s17, %s4763_s17 }
 0x10a   :  { %v472_v18 = vmax.f32 %v468_v13, 0.0  ;;  %v5195_v19 = vpack.c.bf16 %v1196_v12, %v1195_v15 }
 0x10b   :  { %v471_v20 = vmax.f32 %v467_v17, 0.0  ;;  %4477 = vmatprep.subr.bf16.mxu0 %v5192_v16  ;;  %p4770_p11 = por %p4769_p10, %p4768_p9 }
 0x10c   :  { %4479 = vmatpush3.bf16.msra.mxu0 %v5192_v16 }
 0x10d   :  { %v5199_v21 = vpack.c.bf16 %v472_v18, %v471_v20  ;;  %p4771_p12 = pnand %p4770_p11, %p4764_p8 }
 0x10f   :  { %4481 = vmatprep.subr.bf16.mxu0 %v5199_v21 }
 0x110   :  { %v4178_v22 = vpop.f32.mrb[8].mxu1  ;;  %4483 = vmatpush3.bf16.msra.mxu0 %v5199_v21 }
 0x111   :  { %v1552_v24 = vadd.f32 %v4178_v22, %v5167_v34  ;;  %v1532_v25 = vpop.f32.mrb[9].mxu1  ;;  %4485 = vmatprep.subr.bf16.mxu0 %v4484_v52 }
 0x112   :  { %v1551_v27 = vadd.f32 %v1532_v25, %v5161_v31 }
 0x113   :  { %v1556_v28 = vmax.f32 %v1552_v24, 0.0  ;;  %v4098_v29 = vpop.f32.mrb[8].mxu0  ;;  %4191 = vmatmul.mubr.msk.f32.vlgmr.msra.gmra.mrb[22].mxu0 %vm1571_vm2, %v5206_v23 }
 0x114   :  { %v1555_v36 = vmax.f32 %v1551_v27, 0.0  ;;  %v647_v38 = vadd.f32 %v4098_v29, %v5167_v34  ;;  %v4181_v39 = vpop.f32.mrb[10].mxu1  ;;  %v627_v40 = vpop.f32.mrb[9].mxu0  ;;  %4487 = vmatpush3.bf16.msra.mxu0 %v4484_v52  ;;  %4193 = vmatprep.mubr.msk.f32.mxu0 %vm1571_vm2, %v5212_v26 }
 0x115   :  { %v1554_v42 = vadd.f32 %v4181_v39, %v5171_v37  ;;  %v646_v43 = vadd.f32 %v627_v40, %v5161_v31  ;;  %v1542_v44 = vpop.f32.mrb[11].mxu1  ;;  %4489 = vmatprep.subr.bf16.mxu0 %v5181_v57 }
 0x116   :  { %v5233_v46 = vpack.c.bf16 %v1556_v28, %v1555_v36  ;;  %v651_v47 = vmax.f32 %v647_v38, 0.0  ;;  %v1553_v48 = vadd.f32 %v1542_v44, %v5163_v32 }
 0x117   :  { %v1558_v49 = vmax.f32 %v1554_v42, 0.0  ;;  %v650_v50 = vmax.f32 %v646_v43, 0.0  ;;  %v4101_v51 = vpop.f32.mrb[10].mxu0  ;;  %4194 = vmatmul.mubr.msk.f32.gmra.mrb[24].mxu0 %vm1571_vm2, %v5223_v41 }
 0x118   :  { %v1557_v52 = vmax.f32 %v1553_v48, 0.0  ;;  %v649_v53 = vadd.f32 %v4101_v51, %v5171_v37  ;;  %v637_v54 = vpop.f32.mrb[11].mxu0  ;;  %4491 = vmatpush3.bf16.msra.mxu0 %v5181_v57  ;;  %4204 = vmatprep.mubr.msk.f32.mxu0 %vm1571_vm2, %v5231_v45 }
 0x119   :  { %v4492_v58 = vpack.c.bf16 %v651_v47, %v650_v50  ;;  %v648_v59 = vadd.f32 %v637_v54, %v5163_v32 }
 0x11a   :  { %v5253_v61 = vpack.c.bf16 %v1558_v49, %v1557_v52  ;;  %v653_v62 = vmax.f32 %v649_v53, 0.0 }
 0x11b   :  { %v652_v57 = vmax.f32 %v648_v59, 0.0  ;;  %v4106_v63 = vpop.f32.mrb[12].mxu0  ;;  %4205 = vmatmul.mubr.msk.f32.vlgmr.msra.gmra.mrb[22].mxu0 %vm1571_vm2, %v5245_v56  ;;  %4493 = vmatprep.subr.bf16.mxu1 %v4492_v58  ;;  %v2864_v59 = vld [vmem:[#allocation2 + $0x10] sm:$0xff] }
 0x11c   :  { %v814_v0 = vadd.f32 %v5165_v33, %v4106_v63  ;;  %v723_v1 = vpop.f32.mrb[13].mxu0  ;;  %4495 = vmatpush3.bf16.msra.mxu1 %v4492_v58  ;;  %4207 = vmatprep.mubr.msk.f32.mxu0 %vm1571_vm2, %v5251_v60 }
 0x11d   :  { %v4496_v3 = vpack.c.bf16 %v653_v62, %v652_v57  ;;  %v809_v4 = vadd.f32 %v5169_v35, %v723_v1  ;;  %v2865_v57 = vld [vmem:[#allocation2 + $0x18] sm:$0xff] }
 0x11e   :  { %v828_v5 = vadd.f32 %v814_v0, %v5167_v34  ;;  %v2866_v0 = vld [vmem:[#allocation2 + $0x20] sm:$0xff] }
 0x11f   :  { %v827_v6 = vadd.f32 %v809_v4, %v5161_v31  ;;  %4208 = vmatmul.mubr.msk.f32.gmra.mrb[24].mxu0 %vm1571_vm2, %v5263_v2  ;;  %4497 = vmatprep.subr.bf16.mxu1 %v4496_v3 }
 0x120   :  { %v832_v33 = vmax.f32 %v828_v5, 0.0  ;;  %4499 = vmatpush3.bf16.msra.mxu1 %v4496_v3  ;;  %4246 = vmatprep.mubr.msk.f32.mxu0 %vm1571_vm2, %v5155_v30 }
 0x121   :  { %v831_v7 = vmax.f32 %v827_v6, 0.0  ;;  %4501 = vmatprep.subr.bf16.mxu1 %v5192_v16 }
 0x123   :  { %v4508_v9 = vpack.c.bf16 %v832_v33, %v831_v7  ;;  %4219 = vmatmul.mubr.msk.f32.vlgmr.msra.gmra.mrb[12].mxu1 %vm1571_vm2, %v5206_v23 }
 0x124   :  { %4503 = vmatpush3.bf16.msra.mxu1 %v5192_v16  ;;  %4221 = vmatprep.mubr.msk.f32.mxu1 %vm1571_vm2, %v5212_v26 }
 0x125   :  { %4505 = vmatprep.subr.bf16.mxu1 %v5199_v21  ;;  %4509 = vmatprep.subr.bf16.mxu0 %v4508_v9 }
 0x126   :  { %4511 = vmatpush3.bf16.msra.mxu0 %v4508_v9 }
 0x127   :  { %v4130_v35 = vpop.f32.mrb[14].mxu0  ;;  %4222 = vmatmul.mubr.msk.f32.gmra.mrb[14].mxu1 %vm1571_vm2, %v5223_v41  ;;  %4513 = vmatprep.subr.bf16.mxu0 %v5179_v55 }
 0x128   :  { %v1009_v10 = vadd.f32 %v4130_v35, %v5167_v34  ;;  %v989_v11 = vpop.f32.mrb[15].mxu0  ;;  %4507 = vmatpush3.bf16.msra.mxu1 %v5199_v21  ;;  %4232 = vmatprep.mubr.msk.f32.mxu1 %vm1571_vm2, %v5231_v45 }
 0x129   :  { %v1008_v12 = vadd.f32 %v989_v11, %v5161_v31 }
 0x12a   :  { %v1013_v13 = vmax.f32 %v1009_v10, 0.0  ;;  %4515 = vmatpush3.bf16.msra.mxu0 %v5179_v55 }
 0x12b   :  { %v1012_v14 = vmax.f32 %v1008_v12, 0.0  ;;  %v4133_v15 = vpop.f32.mrb[16].mxu0  ;;  %4233 = vmatmul.mubr.msk.f32.vlgmr.msra.gmra.mrb[12].mxu1 %vm1571_vm2, %v5245_v56  ;;  %4517 = vmatprep.subr.bf16.mxu0 %v4492_v58 }
 0x12c   :  { %v1011_v16 = vadd.f32 %v4133_v15, %v5171_v37  ;;  %v999_v17 = vpop.f32.mrb[17].mxu0  ;;  %4235 = vmatprep.mubr.msk.f32.mxu1 %vm1571_vm2, %v5251_v60  ;;  %v2867_v15 = vld [vmem:[#allocation2 + $0x28] sm:$0xff] }
 0x12d   :  { %v4524_v18 = vpack.c.bf16 %v1013_v13, %v1012_v14  ;;  %v1010_v20 = vadd.f32 %v999_v17, %v5163_v32  ;;  %4247 = vmatmul.mubr.msk.f32.vlgmr.msra.gmra.mrb[26].mxu0 %vm1571_vm2, %v5206_v23 }
 0x12e   :  { %v1015_v21 = vmax.f32 %v1011_v16, 0.0  ;;  %4519 = vmatpush3.bf16.msra.mxu0 %v4492_v58  ;;  %4249 = vmatprep.mubr.msk.f32.mxu0 %vm1571_vm2, %v5212_v26  ;;  %v2863_v58 = vld [vmem:[#allocation2 + $0x8] sm:$0xff] }
 0x12f   :  { %v1014_v22 = vmax.f32 %v1010_v20, 0.0  ;;  %4236 = vmatmul.mubr.msk.f32.gmra.mrb[14].mxu1 %vm1571_vm2, %v5263_v2  ;;  %4521 = vmatprep.subr.bf16.mxu0 %v4496_v3 }
 0x130   :  { %4525 = vmatprep.subr.bf16.mxu1 %v4524_v18  ;;  %4274 = vmatprep.mubr.msk.f32.mxu1 %vm1571_vm2, %v5155_v30 }
 0x131   :  { %v4528_v24 = vpack.c.bf16 %v1015_v21, %v1014_v22  ;;  %4527 = vmatpush3.bf16.msra.mxu1 %v4524_v18  ;;  %4250 = vmatmul.mubr.msk.f32.gmra.mrb[28].mxu0 %vm1571_vm2, %v5223_v41 }
 0x132   :  { %4523 = vmatpush3.bf16.msra.mxu0 %v4496_v3  ;;  %4260 = vmatprep.mubr.msk.f32.mxu0 %vm1571_vm2, %v5231_v45 }
 0x133   :  { %4529 = vmatprep.subr.bf16.mxu1 %v4528_v24  ;;  %4541 = vmatprep.subr.bf16.mxu0 %v5188_v8 }
 0x135   :  { %4531 = vmatpush3.bf16.msra.mxu1 %v4528_v24  ;;  %4261 = vmatmul.mubr.msk.f32.vlgmr.msra.gmra.mrb[26].mxu0 %vm1571_vm2, %v5245_v56 }
 0x136   :  { %4533 = vmatprep.subr.bf16.mxu1 %v4508_v9  ;;  %4543 = vmatpush3.bf16.msra.mxu0 %v5188_v8 }
 0x137   :  { %v4162_v25 = vpop.f32.mrb[18].mxu0  ;;  %4545 = vmatprep.subr.bf16.mxu0 %v5195_v19  ;;  %4263 = vmatprep.mubr.msk.f32.mxu0 %vm1571_vm2, %v5251_v60 }
 0x138   :  { %v1371_v27 = vadd.f32 %v4162_v25, %v5167_v34  ;;  %4275 = vmatmul.mubr.msk.f32.vlgmr.msra.gmra.mrb[16].mxu1 %vm1571_vm2, %v5206_v23  ;;  %v1351_v28 = vpop.f32.mrb[19].mxu0 }
 0x139   :  { %v1370_v29 = vadd.f32 %v1351_v28, %v5161_v31  ;;  %4535 = vmatpush3.bf16.msra.mxu1 %v4508_v9  ;;  %4264 = vmatmul.mubr.msk.f32.gmra.mrb[28].mxu0 %vm1571_vm2, %v5263_v2 }
 0x13a   :  { %v1375_v36 = vmax.f32 %v1371_v27, 0.0  ;;  %4537 = vmatprep.subr.bf16.mxu1 %v5179_v55  ;;  %4277 = vmatprep.mubr.msk.f32.mxu1 %vm1571_vm2, %v5212_v26  ;;  %v2869_v27 = vld [vmem:[#allocation2 + $0x38] sm:$0xff] }
 0x13b   :  { %v1374_v38 = vmax.f32 %v1370_v29, 0.0  ;;  %4547 = vmatpush3.bf16.msra.mxu0 %v5195_v19  ;;  %v4165_v34 = vpop.f32.mrb[20].mxu0  ;;  %4302 = vmatprep.mubr.msk.f32.mxu0 %vm1571_vm2, %v5155_v30  ;;  %v2870_v29 = vld [vmem:[#allocation2 + $0x40] sm:$0xff] }
 0x13c   :  { %v1373_v39 = vadd.f32 %v4165_v34, %v5171_v37  ;;  %4278 = vmatmul.mubr.msk.f32.gmra.mrb[18].mxu1 %vm1571_vm2, %v5223_v41  ;;  %4549 = vmatprep.subr.bf16.mxu0 %v4524_v18  ;;  %v1361_v31 = vpop.f32.mrb[21].mxu0 }
 0x13d   :  { %v4556_v40 = vpack.c.bf16 %v1375_v36, %v1374_v38  ;;  %v1372_v42 = vadd.f32 %v1361_v31, %v5163_v32  ;;  %4539 = vmatpush3.bf16.msra.mxu1 %v5179_v55  ;;  %4288 = vmatprep.mubr.msk.f32.mxu1 %vm1571_vm2, %v5231_v45  ;;  %v5393_v32 = vpop.permute.xlu1 %1773  ;;  %v5395_v55 = vpop.permute.xlu0 %1768 }
 0x13e   :  { %v1377_v43 = vmax.f32 %v1373_v39, 0.0  ;;  %4303 = vmatmul.mubr.msk.f32.vlgmr.msra.gmra.mrb[30].mxu0 %vm1571_vm2, %v5206_v23 }
 0x13f   :  { %v1376_v44 = vmax.f32 %v1372_v42, 0.0  ;;  %4551 = vmatpush3.bf16.msra.mxu0 %v4524_v18  ;;  %4557 = vmatprep.subr.bf16.mxu1 %v4556_v40  ;;  %v2868_v18 = vld [vmem:[#allocation2 + $0x30] sm:$0xff] }
 0x140   :  { %4289 = vmatmul.mubr.msk.f32.vlgmr.msra.gmra.mrb[16].mxu1 %vm1571_vm2, %v5245_v56  ;;  %4553 = vmatprep.subr.bf16.mxu0 %v4528_v24 }
 0x141   :  { %v4560_v37 = vpack.c.bf16 %v1377_v43, %v1376_v44  ;;  %4305 = vmatprep.mubr.msk.f32.mxu0 %vm1571_vm2, %v5212_v26  ;;  %4559 = vmatpush3.bf16.msra.mxu1 %v4556_v40  ;;  %v5401_v48 = vpop.permute.xlu0 %1778  ;;  %v2872_v43 = vld [vmem:[#allocation2 + $0x50] sm:$0xff] }
 0x142   :  { %4306 = vmatmul.mubr.msk.f32.gmra.mrb[32].mxu0 %vm1571_vm2, %v5223_v41  ;;  %4291 = vmatprep.mubr.msk.f32.mxu1 %vm1571_vm2, %v5251_v60 }
 0x143   :  { %4555 = vmatpush3.bf16.msra.mxu0 %v4528_v24  ;;  %4561 = vmatprep.subr.bf16.mxu1 %v4560_v37 }
 0x144   :  { %4292 = vmatmul.mubr.msk.f32.gmra.mrb[18].mxu1 %vm1571_vm2, %v5263_v2  ;;  %4573 = vmatprep.subr.bf16.mxu0 %v5233_v46 }
 0x145   :  { %4316 = vmatprep.mubr.msk.f32.mxu0 %vm1571_vm2, %v5231_v45  ;;  %4563 = vmatpush3.bf16.msra.mxu1 %v4560_v37 }
 0x146   :  { %4317 = vmatmul.mubr.msk.f32.vlgmr.msra.gmra.mrb[30].mxu0 %vm1571_vm2, %v5245_v56  ;;  %4565 = vmatprep.subr.bf16.mxu1 %v5188_v8 }
 0x147   :  { %4330 = vmatprep.mubr.msk.f32.mxu1 %vm1571_vm2, %v5155_v30  ;;  %4575 = vmatpush3.bf16.msra.mxu0 %v5233_v46 }
 0x148   :  { %4331 = vmatmul.mubr.msk.f32.vlgmr.msra.gmra.mrb[20].mxu1 %vm1571_vm2, %v5206_v23  ;;  %4577 = vmatprep.subr.bf16.mxu0 %v5253_v61 }
 0x149   :  { %4319 = vmatprep.mubr.msk.f32.mxu0 %vm1571_vm2, %v5251_v60  ;;  %4567 = vmatpush3.bf16.msra.mxu1 %v5188_v8 }
 0x14a   :  { %4320 = vmatmul.mubr.msk.f32.gmra.mrb[32].mxu0 %vm1571_vm2, %v5263_v2  ;;  %4569 = vmatprep.subr.bf16.mxu1 %v5195_v19 }
 0x14b   :  { %4333 = vmatprep.mubr.msk.f32.mxu1 %vm1571_vm2, %v5212_v26  ;;  %4579 = vmatpush3.bf16.msra.mxu0 %v5253_v61 }
 0x14c   :  { %4334 = vmatmul.mubr.msk.f32.gmra.mrb[22].mxu1 %vm1571_vm2, %v5223_v41  ;;  %4581 = vmatprep.subr.bf16.mxu0 %v4556_v40 }
 0x14d   :  { %4571 = vmatpush3.bf16.msra.mxu1 %v5195_v19  ;;  %4358 = vmatprep.mubr.msk.f32.mxu0 %vm1571_vm2, %v5155_v30  ;;  %v2862_v30 = vld [vmem:[#allocation2] sm:$0xff] }
 0x14e   :  { %4359 = vmatmul.mubr.msk.f32.vlgmr.msra.gmra.mrb[34].mxu0 %vm1571_vm2, %v5206_v23  ;;  %4344 = vmatprep.mubr.msk.f32.mxu1 %vm1571_vm2, %v5231_v45 }
 0x14f   :  { %4583 = vmatpush3.bf16.msra.mxu0 %v4556_v40  ;;  %4361 = vmatprep.mubr.msk.f32.mxu0 %vm1571_vm2, %v5212_v26  ;;  %v2871_v40 = vld [vmem:[#allocation2 + $0x48] sm:$0xff] }
 0x150   :  { %4345 = vmatmul.mubr.msk.f32.vlgmr.msra.gmra.mrb[20].mxu1 %vm1571_vm2, %v5245_v56  ;;  %4585 = vmatprep.subr.bf16.mxu0 %v4560_v37 }
 0x151   :  { %4347 = vmatprep.mubr.msk.f32.mxu1 %vm1571_vm2, %v5251_v60 }
 0x152   :  { %4362 = vmatmul.mubr.msk.f32.gmra.mrb[36].mxu0 %vm1571_vm2, %v5223_v41 }
 0x153   :  { %4587 = vmatpush3.bf16.msra.mxu0 %v4560_v37  ;;  %4372 = vmatprep.mubr.msk.f32.mxu0 %vm1571_vm2, %v5231_v45  ;;  %v5399_v45 = vpop.permute.xlu1 %1783 }
 0x154   :  { %4348 = vmatmul.mubr.msk.f32.gmra.mrb[22].mxu1 %vm1571_vm2, %v5263_v2 }
 0x155   :  { %4386 = vmatprep.mubr.msk.f32.mxu1 %vm1571_vm2, %v2862_v30 }
 0x156   :  { %4373 = vmatmul.mubr.msk.f32.vlgmr.msra.gmra.mrb[34].mxu0 %vm1571_vm2, %v5245_v56 }
 0x157   :  { %4375 = vmatprep.mubr.msk.f32.mxu0 %vm1571_vm2, %v5251_v60 }
 0x15a   :  { %4376 = vmatmul.mubr.msk.f32.gmra.mrb[36].mxu0 %vm1571_vm2, %v5263_v2 }
 0x1ee   :  { %v4206_v8 = vpop.f32.mrb[22].mxu0 }
 0x1ef   :  { %v1787_v19 = vadd.f32 %v4206_v8, %v5393_v32  ;;  %v1747_v23 = vpop.f32.mrb[23].mxu0 }
 0x1f0   :  { %v1786_v26 = vadd.f32 %v5395_v55, %v1747_v23 }
 0x1f1   :  { %v1791_v41 = vmax.f32 %v1787_v19, 0.0 }
 0x1f2   :  { %v1790_v46 = vmax.f32 %v1786_v26, 0.0  ;;  %v4209_v47 = vpop.f32.mrb[24].mxu0 }
 0x1f3   :  { %v1789_v49 = vadd.f32 %v4209_v47, %v5399_v45  ;;  %v1757_v50 = vpop.f32.mrb[25].mxu0 }
 0x1f4   :  { %v4588_v51 = vpack.c.bf16 %v1791_v41, %v1790_v46  ;;  %v1788_v52 = vadd.f32 %v5401_v48, %v1757_v50 }
 0x1f5   :  { %v1793_v53 = vmax.f32 %v1789_v49, 0.0  ;;  %v2873_v49 = vld [vmem:[#allocation2 + $0x58] sm:$0xff] }
 0x1f6   :  { %v1792_v54 = vmax.f32 %v1788_v52, 0.0  ;;  %4589 = vmatprep.subr.bf16.mxu1 %v4588_v51  ;;  %v2874_v52 = vld [vmem:[#allocation2 + $0x60] sm:$0xff] }
 0x1f7   :  { %4591 = vmatpush3.bf16.msra.mxu1 %v4588_v51 }
 0x1f8   :  { %v4592_v56 = vpack.c.bf16 %v1793_v53, %v1792_v54 }
 0x1fa   :  { %4593 = vmatprep.subr.bf16.mxu1 %v4592_v56 }
 0x1fb   :  { %4595 = vmatpush3.bf16.msra.mxu1 %v4592_v56 }
 0x1fe   :  { %v4234_v60 = vpop.f32.mrb[12].mxu1  ;;  %4387 = vmatmul.mubr.msk.f32.vlgmr.msra.gmra.mrb[24].mxu1 %vm1571_vm2, %v2863_v58 }
 0x1ff   :  { %v1965_v61 = vadd.f32 %v4234_v60, %v5393_v32  ;;  %v1945_v62 = vpop.f32.mrb[13].mxu1  ;;  %4389 = vmatprep.mubr.msk.f32.mxu1 %vm1571_vm2, %v2864_v59 }
 0x200   :  { %v1964_v63 = vadd.f32 %v1945_v62, %v5395_v55 }
 0x201   :  { %v1969_v1 = vmax.f32 %v1965_v61, 0.0 }
 0x202   :  { %v1968_v2 = vmax.f32 %v1964_v63, 0.0  ;;  %v4237_v3 = vpop.f32.mrb[14].mxu1  ;;  %4390 = vmatmul.mubr.msk.f32.gmra.mrb[26].mxu1 %vm1571_vm2, %v2865_v57  ;;  %v2875_v63 = vld [vmem:[#allocation2 + $0x68] sm:$0xff] }
 0x203   :  { %v1967_v4 = vadd.f32 %v4237_v3, %v5399_v45  ;;  %v1955_v5 = vpop.f32.mrb[15].mxu1  ;;  %4400 = vmatprep.mubr.msk.f32.mxu1 %vm1571_vm2, %v2866_v0 }
 0x204   :  { %v4596_v6 = vpack.c.bf16 %v1969_v1, %v1968_v2  ;;  %v1966_v33 = vadd.f32 %v1955_v5, %v5401_v48  ;;  %v2876_v1 = vld [vmem:[#allocation2 + $0x70] sm:$0xff] }
 0x205   :  { %v1971_v7 = vmax.f32 %v1967_v4, 0.0 }
 0x206   :  { %v1970_v9 = vmax.f32 %v1966_v33, 0.0  ;;  %4597 = vmatprep.subr.bf16.mxu1 %v4596_v6 }
 0x207   :  { %4599 = vmatpush3.bf16.msra.mxu1 %v4596_v6  ;;  %v2877_v6 = vld [vmem:[#allocation2 + $0x78] sm:$0xff] }
 0x208   :  { %v4600_v35 = vpack.c.bf16 %v1971_v7, %v1970_v9  ;;  %v4262_v10 = vpop.f32.mrb[26].mxu0  ;;  %v2878_v7 = vld [vmem:[#allocation2 + $0x80] sm:$0xff] }
 0x209   :  { %v2143_v11 = vadd.f32 %v4262_v10, %v5393_v32  ;;  %v2123_v12 = vpop.f32.mrb[27].mxu0 }
 0x20a   :  { %v2142_v13 = vadd.f32 %v2123_v12, %v5395_v55  ;;  %4601 = vmatprep.subr.bf16.mxu1 %v4600_v35 }
 0x20b   :  { %v2147_v14 = vmax.f32 %v2143_v11, 0.0  ;;  %4603 = vmatpush3.bf16.msra.mxu1 %v4600_v35 }
 0x20c   :  { %v2146_v16 = vmax.f32 %v2142_v13, 0.0  ;;  %v4265_v17 = vpop.f32.mrb[28].mxu0  ;;  %v2879_v13 = vld [vmem:[#allocation2 + $0x88] sm:$0xff] }
 0x20d   :  { %v2145_v20 = vadd.f32 %v4265_v17, %v5399_v45  ;;  %v2133_v21 = vpop.f32.mrb[29].mxu0  ;;  %v2880_v17 = vld [vmem:[#allocation2 + $0x90] sm:$0xff] }
 0x20e   :  { %v4604_v22 = vpack.c.bf16 %v2147_v14, %v2146_v16  ;;  %v2144_v24 = vadd.f32 %v2133_v21, %v5401_v48  ;;  %4401 = vmatmul.mubr.msk.f32.vlgmr.msra.gmra.mrb[24].mxu1 %vm1571_vm2, %v2867_v15 }
 0x20f   :  { %v2149_v25 = vmax.f32 %v2145_v20, 0.0  ;;  %4403 = vmatprep.mubr.msk.f32.mxu1 %vm1571_vm2, %v2868_v18 }
 0x210   :  { %v2148_v28 = vmax.f32 %v2144_v24, 0.0  ;;  %4605 = vmatprep.subr.bf16.mxu1 %v4604_v22 }
 0x211   :  { %4607 = vmatpush3.bf16.msra.mxu1 %v4604_v22 }
 0x212   :  { %v4608_v36 = vpack.c.bf16 %v2149_v25, %v2148_v28  ;;  %4404 = vmatmul.mubr.msk.f32.gmra.mrb[26].mxu1 %vm1571_vm2, %v2869_v27  ;;  %v2881_v27 = vld [vmem:[#allocation2 + $0x98] sm:$0xff] }
 0x213   :  { %v4290_v38 = vpop.f32.mrb[16].mxu1  ;;  %4414 = vmatprep.mubr.msk.f32.mxu1 %vm1571_vm2, %v2870_v29 }
 0x214   :  { %v2321_v34 = vadd.f32 %v4290_v38, %v5393_v32  ;;  %v2301_v39 = vpop.f32.mrb[17].mxu1  ;;  %4609 = vmatprep.subr.bf16.mxu1 %v4608_v36  ;;  %v2882_v38 = vld [vmem:[#allocation2 + $0xa0] sm:$0xff] }
 0x215   :  { %v2320_v31 = vadd.f32 %v2301_v39, %v5395_v55  ;;  %4611 = vmatpush3.bf16.msra.mxu1 %v4608_v36 }
 0x216   :  { %v2325_v42 = vmax.f32 %v2321_v34, 0.0 }
 0x217   :  { %v2324_v44 = vmax.f32 %v2320_v31, 0.0  ;;  %v4293_v37 = vpop.f32.mrb[18].mxu1 }
 0x218   :  { %v2323_v30 = vadd.f32 %v4293_v37, %v5399_v45  ;;  %v2311_v8 = vpop.f32.mrb[19].mxu1  ;;  %4415 = vmatmul.mubr.msk.f32.vlgmr.msra.gmra.mrb[24].mxu1 %vm1571_vm2, %v2871_v40  ;;  %v2883_v40 = vld [vmem:[#allocation2 + $0xa8] sm:$0xff] }
 0x219   :  { %v4612_v19 = vpack.c.bf16 %v2325_v42, %v2324_v44  ;;  %v2322_v23 = vadd.f32 %v2311_v8, %v5401_v48  ;;  %v4318_v26 = vpop.f32.mrb[30].mxu0  ;;  %4417 = vmatprep.mubr.msk.f32.mxu1 %vm1571_vm2, %v2872_v43  ;;  %v2884_v43 = vld [vmem:[#allocation2 + $0xb0] sm:$0xff]  ;;  %v2887_v37 = vld [vmem:[#allocation2 + $0xc8] sm:$0xff]  ;;  %v2889_v8 = vld [vmem:[#allocation2 + $0xd8] sm:$0xff] }
 0x21a   :  { %v2327_v41 = vmax.f32 %v2323_v30, 0.0  ;;  %v2499_v46 = vadd.f32 %v4318_v26, %v5393_v32  ;;  %v2479_v47 = vpop.f32.mrb[31].mxu0  ;;  %v2888_v30 = vld [vmem:[#allocation2 + $0xd0] sm:$0xff] }
 0x21b   :  { %v2326_v50 = vmax.f32 %v2322_v23, 0.0  ;;  %v2498_v51 = vadd.f32 %v2479_v47, %v5395_v55  ;;  %4613 = vmatprep.subr.bf16.mxu1 %v4612_v19  ;;  %v2994_v23 = vpop.permute.xlu0 %2993 }
 0x21c   :  { %v2503_v53 = vmax.f32 %v2499_v46, 0.0  ;;  %4615 = vmatpush3.bf16.msra.mxu1 %v4612_v19  ;;  %v2999_v19 = vpop.permute.xlu1 %2998 }
 0x21d   :  { %v4616_v54 = vpack.c.bf16 %v2327_v41, %v2326_v50  ;;  %v2502_v56 = vmax.f32 %v2498_v51, 0.0  ;;  %v4321_v58 = vpop.f32.mrb[32].mxu0  ;;  %4418 = vmatmul.mubr.msk.f32.gmra.mrb[26].mxu1 %vm1571_vm2, %v2873_v49 }
 0x21e   :  { %v2501_v59 = vadd.f32 %v4321_v58, %v5399_v45  ;;  %v2489_v60 = vpop.f32.mrb[33].mxu0  ;;  %4428 = vmatprep.mubr.msk.f32.mxu1 %vm1571_vm2, %v2874_v52 }
 0x21f   :  { %v4620_v61 = vpack.c.bf16 %v2503_v53, %v2502_v56  ;;  %v2500_v62 = vadd.f32 %v2489_v60, %v5401_v48  ;;  %4617 = vmatprep.subr.bf16.mxu1 %v4616_v54  ;;  %v3004_v51 = vpop.permute.xlu0 %3003 }
 0x220   :  { %v2505_v57 = vmax.f32 %v2501_v59, 0.0  ;;  %4619 = vmatpush3.bf16.msra.mxu1 %v4616_v54  ;;  %v3009_v49 = vpop.permute.xlu1 %3008 }
 0x221   :  { %v2504_v0 = vmax.f32 %v2500_v62, 0.0  ;;  %4621 = vmatprep.subr.bf16.mxu1 %v4620_v61 }
 0x223   :  { %v4624_v2 = vpack.c.bf16 %v2505_v57, %v2504_v0  ;;  %v4346_v3 = vpop.f32.mrb[20].mxu1  ;;  %4429 = vmatmul.mubr.msk.f32.vlgmr.msra.gmra.mrb[24].mxu1 %vm1571_vm2, %v2875_v63 }
 0x224   :  { %v2677_v4 = vadd.f32 %v4346_v3, %v5393_v32  ;;  %v2657_v5 = vpop.f32.mrb[21].mxu1  ;;  %4623 = vmatpush3.bf16.msra.mxu1 %v4620_v61  ;;  %4431 = vmatprep.mubr.msk.f32.mxu1 %vm1571_vm2, %v2876_v1 }
 0x225   :  { %v2676_v33 = vadd.f32 %v2657_v5, %v5395_v55  ;;  %4625 = vmatprep.subr.bf16.mxu1 %v4624_v2 }
 0x226   :  { %v2681_v9 = vmax.f32 %v2677_v4, 0.0 }
 0x227   :  { %v2680_v35 = vmax.f32 %v2676_v33, 0.0  ;;  %v4349_v10 = vpop.f32.mrb[22].mxu1  ;;  %4432 = vmatmul.mubr.msk.f32.gmra.mrb[26].mxu1 %vm1571_vm2, %v2877_v6 }
 0x228   :  { %v2679_v11 = vadd.f32 %v4349_v10, %v5399_v45  ;;  %v2667_v12 = vpop.f32.mrb[23].mxu1  ;;  %4627 = vmatpush3.bf16.msra.mxu1 %v4624_v2  ;;  %4442 = vmatprep.mubr.msk.f32.mxu1 %vm1571_vm2, %v2878_v7 }
 0x229   :  { %v4628_v14 = vpack.c.bf16 %v2681_v9, %v2680_v35  ;;  %v2678_v15 = vadd.f32 %v2667_v12, %v5401_v48  ;;  %v4374_v16 = vpop.f32.mrb[34].mxu0 }
 0x22a   :  { %v2683_v18 = vmax.f32 %v2679_v11, 0.0  ;;  %v2855_v20 = vadd.f32 %v4374_v16, %v5393_v32  ;;  %v2835_v21 = vpop.f32.mrb[35].mxu0 }
 0x22b   :  { %v2682_v22 = vmax.f32 %v2678_v15, 0.0  ;;  %v2854_v24 = vadd.f32 %v2835_v21, %v5395_v55  ;;  %4443 = vmatmul.mubr.msk.f32.vlgmr.msra.gmra.mrb[24].mxu1 %vm1571_vm2, %v2879_v13  ;;  %4629 = vmatprep.subr.bf16.mxu1 %v4628_v14 }
 0x22c   :  { %v2859_v25 = vmax.f32 %v2855_v20, 0.0  ;;  %4631 = vmatpush3.bf16.msra.mxu1 %v4628_v14  ;;  %4445 = vmatprep.mubr.msk.f32.mxu1 %vm1571_vm2, %v2880_v17 }
 0x22d   :  { %v4632_v28 = vpack.c.bf16 %v2683_v18, %v2682_v22  ;;  %v2858_v29 = vmax.f32 %v2854_v24, 0.0  ;;  %v4377_v36 = vpop.f32.mrb[36].mxu0 }
 0x22e   :  { %v2857_v34 = vadd.f32 %v4377_v36, %v5399_v45  ;;  %v2845_v39 = vpop.f32.mrb[37].mxu0  ;;  %v2885_v45 = vld [vmem:[#allocation2 + $0xb8] sm:$0xff] }
 0x22f   :  { %v4636_v32 = vpack.c.bf16 %v2859_v25, %v2858_v29  ;;  %v2856_v31 = vadd.f32 %v2845_v39, %v5401_v48  ;;  %4446 = vmatmul.mubr.msk.f32.gmra.mrb[26].mxu1 %vm1571_vm2, %v2881_v27  ;;  %4633 = vmatprep.subr.bf16.mxu1 %v4632_v28  ;;  %v2886_v48 = vld [vmem:[#allocation2 + $0xc0] sm:$0xff] }
 0x230   :  { %v2861_v55 = vmax.f32 %v2857_v34, 0.0  ;;  %4635 = vmatpush3.bf16.msra.mxu1 %v4632_v28  ;;  %4456 = vmatprep.mubr.msk.f32.mxu1 %vm1571_vm2, %v2882_v38 }
 0x231   :  { %v2860_v42 = vmax.f32 %v2856_v31, 0.0  ;;  %4637 = vmatprep.subr.bf16.mxu1 %v4636_v32 }
 0x233   :  { %v4640_v44 = vpack.c.bf16 %v2861_v55, %v2860_v42  ;;  %4457 = vmatmul.mubr.msk.f32.vlgmr.msra.gmra.mrb[24].mxu1 %vm1571_vm2, %v2883_v40 }
 0x234   :  { %4639 = vmatpush3.bf16.msra.mxu1 %v4636_v32  ;;  %4459 = vmatprep.mubr.msk.f32.mxu1 %vm1571_vm2, %v2884_v43 }
 0x235   :  { %4641 = vmatprep.subr.bf16.mxu1 %v4640_v44 }
 0x237   :  { %4460 = vmatmul.mubr.msk.f32.gmra.mrb[26].mxu1 %vm1571_vm2, %v2885_v45 }
 0x238   :  { %4643 = vmatpush3.bf16.msra.mxu1 %v4640_v44  ;;  %4470 = vmatprep.mubr.msk.f32.mxu1 %vm1571_vm2, %v2886_v48 }
 0x23b   :  { %4471 = vmatmul.mubr.msk.f32.vlgmr.msra.gmra.mrb[24].mxu1 %vm1571_vm2, %v2887_v37 }
 0x23c   :  { %4473 = vmatprep.mubr.msk.f32.mxu1 %vm1571_vm2, %v2888_v30 }
 0x23f   :  { %4474 = vmatmul.mubr.msk.f32.gmra.mrb[26].mxu1 %vm1571_vm2, %v2889_v8 }
 0x30e   :  { %v4472_v26 = vpop.f32.mrb[24].mxu1 }
 0x30f   :  { %v4648_v41 = vadd.f32 %v4472_v26, %v2999_v19  ;;  %v3598_v46 = vpop.f32.mrb[25].mxu1 }
 0x310   :  { %v4649_v47 = vadd.f32 %v3598_v46, %v2994_v23 }
 0x311   :  { %3622 = vst [vmem:[#allocation5 + $0x8] sm:$0xff] %v4648_v41 }
 0x312   :  { %3621 = vst [vmem:[#allocation5] sm:$0xff] %v4649_v47  ;;  %v4475_v50 = vpop.f32.mrb[26].mxu1 }
 0x313   :  { %v4650_v52 = vadd.f32 %v4475_v50, %v3009_v49  ;;  %v3608_v53 = vpop.f32.mrb[27].mxu1 }
 0x314   :  { %v4651_v54 = vadd.f32 %v3608_v53, %v3004_v51 }
 0x315   :  { %3624 = vst [vmem:[#allocation5 + $0x18] sm:$0xff] %v4650_v52 }
 0x316   :  { %3623 = vst [vmem:[#allocation5 + $0x10] sm:$0xff] %v4651_v54 }
 0x317   :  { %4774 = shalt.err (!%p4771_p12)
}
 0x318   :  { %s4775_s20 = scalar_lea.hbm %s5478_s7, 512 }
 0x319   :  { %p4776_p13 = scmp.ne.s32.totalorder %s5478_s7, %s4775_s20  ;;  %p4779_p0 = scmp.lt.u32.totalorder %s4775_s20, %s5478_s7 }
 0x31b   :  { %p4781_p1 = pnand %p4779_p0, %p4776_p13 }
 0x31d   :  { %4784 = shalt.err (!%p4781_p1)
}
 0x31e   :  { %3636 = dma.vmem_to_hbm [thread:$0]  %s3631_s16, 512, %s5478_s7, [#allocation4], %s4790_s11, %s4790_s11, %s4791_s12  }
 0x31f   :  { %4787 = dma.done.wait [#allocation4], 512  }
 0x320   :  { %4788 = vsyncadd [#allocation4], 4294966784 }
 0x321   :  { %3640 = vsyncpa [#allocation3], 1 }
 0x322   :  { %3641 = vsyncpa [#allocation4], 1 }

</bundles_post_ra>
